<compile_context>
chip_gen: v7x
topology: tpu7x:2x2x1
jax: 0.10.0
libtpu: 0.0.40
codegen_flags: <defaults>
</compile_context>

<pallas_src>
import functools
import math

import jax
import jax.numpy as jnp
from jax.experimental import pallas as pl
from jax.experimental.pallas import tpu as pltpu

# Finite "minus infinity": keeps the online-softmax running max/sum NaN-free.
# NOTE: rows whose mask is entirely zero therefore produce a uniform
# distribution over keys instead of PyTorch's NaN for that row.
_NEG_INF = -1e30


def _round_up(x: int, m: int) -> int:
    return ((x + m - 1) // m) * m


def _sdpa_tile(q_ref, k_ref, v_ref, mask_ref, o_ref, m_sc, l_sc, acc_sc,
               *, scale, sk, tk):
    """One (tq, tk) online-softmax tile for one flattened batch/head."""
    ki = pl.program_id(2)

    @pl.when(ki == 0)
    def _init():
        m_sc[...] = jnp.full_like(m_sc, _NEG_INF)
        l_sc[...] = jnp.zeros_like(l_sc)
        acc_sc[...] = jnp.zeros_like(acc_sc)

    # Keep operands in the input dtype for the MXU; fold 1/sqrt(d_k) into the
    # (tq, d_k) Q tile instead of scaling the (tq, tk) scores.
    q = q_ref[...] * jnp.asarray(scale, dtype=q_ref.dtype)
    k = k_ref[...]

    # QK^T without an explicit transpose: contract trailing d_k of both.
    s = jax.lax.dot_general(
        q, k,
        dimension_numbers=(((1,), (1,)), ((), ())),
        preferred_element_type=jnp.float32,
    )  # (tq, tk) f32

    if mask_ref is not None:
        # mask == 0 -> masked out. Streamed as int8; padded keys are already 0.
        m_tile = mask_ref[...].astype(jnp.int32)
        s = jnp.where(m_tile == 0, _NEG_INF, s)
    elif sk % tk != 0:
        # No user mask: only mask key-padding columns of the last kv tile.
        col = ki * tk + jax.lax.broadcasted_iota(jnp.int32, s.shape, 1)
        s = jnp.where(col < sk, s, _NEG_INF)

    # Online softmax update (statistics in f32 on every chip generation).
    m_prev = m_sc[...]
    m_new = jnp.maximum(m_prev, jnp.max(s, axis=-1, keepdims=True))
    alpha = jnp.exp(m_prev - m_new)
    p = jnp.exp(s - m_new)
    l_sc[...] = alpha * l_sc[...] + jnp.sum(p, axis=-1, keepdims=True)
    acc_sc[...] = alpha * acc_sc[...] + jnp.dot(
        p.astype(v_ref.dtype), v_ref[...], preferred_element_type=jnp.float32)
    m_sc[...] = m_new

    @pl.when(ki == pl.num_programs(2) - 1)
    def _finalize():
        inv_l = pl.reciprocal(l_sc[...], approx=True)  # EUP slot, ~free
        o_ref[...] = (acc_sc[...] * inv_l).astype(o_ref.dtype)


def _sdpa_kernel_masked(q_ref, k_ref, v_ref, mask_ref, o_ref,
                        m_sc, l_sc, acc_sc, *, scale, sk, tk):
    _sdpa_tile(q_ref, k_ref, v_ref, mask_ref, o_ref, m_sc, l_sc, acc_sc,
               scale=scale, sk=sk, tk=tk)


def _sdpa_kernel_nomask(q_ref, k_ref, v_ref, o_ref,
                        m_sc, l_sc, acc_sc, *, scale, sk, tk):
    _sdpa_tile(q_ref, k_ref, v_ref, None, o_ref, m_sc, l_sc, acc_sc,
               scale=scale, sk=sk, tk=tk)


@jax.jit
def scaled_dot_product_attention(query, key, value, mask=None):
    """Pallas flash-attention version of Scaled_Dot_Product_Attention.forward.

    query: [..., Sq, Dk], key: [..., Sk, Dk], value: [..., Sk, Dv],
    mask (optional): broadcastable to [..., Sq, Sk]; 0 == masked out.
    Returns: [..., Sq, Dv] in query's dtype.
    """
    *batch_dims, sq, dk = query.shape
    sk = key.shape[-2]
    dv = value.shape[-1]
    b = math.prod(batch_dims) if batch_dims else 1

    q3 = query.reshape(b, sq, dk)
    k3 = key.reshape(b, sk, dk)
    v3 = value.reshape(b, sk, dv)

    # Tile sizes: query tiles are sublane-aligned (multiple of 8); key tiles
    # are lane-aligned (multiple of 128) so score/mask tiles are lane-dense.
    tq = 128 if sq >= 128 else _round_up(sq, 8)
    sq_pad = _round_up(sq, tq)
    sk_pad = _round_up(sk, 128)
    if sk_pad % 512 == 0:
        tk = 512
    elif sk_pad % 256 == 0:
        tk = 256
    else:
        tk = 128

    pad_q = sq_pad - sq
    pad_k = sk_pad - sk
    if pad_q:
        q3 = jnp.pad(q3, ((0, 0), (0, pad_q), (0, 0)))
    if pad_k:
        k3 = jnp.pad(k3, ((0, 0), (0, pad_k), (0, 0)))
        v3 = jnp.pad(v3, ((0, 0), (0, pad_k), (0, 0)))

    grid = (b, sq_pad // tq, sk_pad // tk)

    q_spec = pl.BlockSpec((pl.Squeezed(), tq, dk), lambda bi, qi, ki: (bi, qi, 0))
    k_spec = pl.BlockSpec((pl.Squeezed(), tk, dk), lambda bi, qi, ki: (bi, ki, 0))
    v_spec = pl.BlockSpec((pl.Squeezed(), tk, dv), lambda bi, qi, ki: (bi, ki, 0))
    o_spec = pl.BlockSpec((pl.Squeezed(), tq, dv), lambda bi, qi, ki: (bi, qi, 0))

    scratch = [
        pltpu.VMEM((tq, 1), jnp.float32),   # running max
        pltpu.VMEM((tq, 1), jnp.float32),   # running sum
        pltpu.VMEM((tq, dv), jnp.float32),  # output accumulator
    ]
    compiler_params = pltpu.CompilerParams(
        dimension_semantics=("parallel", "parallel", "arbitrary"),
        vmem_limit_bytes=32 * 1024 * 1024,
    )
    scale = 1.0 / math.sqrt(dk)

    if mask is None:
        # No-mask fast path: no mask tensor is built or streamed at all.
        kernel = functools.partial(_sdpa_kernel_nomask, scale=scale, sk=sk, tk=tk)
        in_specs = [q_spec, k_spec, v_spec]
        args = (q3, k3, v3)
    else:
        m3 = jnp.broadcast_to(mask, (*batch_dims, sq, sk)).reshape(b, sq, sk)
        m3 = (m3 != 0).astype(jnp.int8)  # 1 byte/elem mask traffic
        if pad_q or pad_k:
            m3 = jnp.pad(m3, ((0, 0), (0, pad_q), (0, pad_k)))
        m_spec = pl.BlockSpec((pl.Squeezed(), tq, tk),
                              lambda bi, qi, ki: (bi, qi, ki))
        kernel = functools.partial(_sdpa_kernel_masked, scale=scale, sk=sk, tk=tk)
        in_specs = [q_spec, k_spec, v_spec, m_spec]
        args = (q3, k3, v3, m3)

    out3 = pl.pallas_call(
        kernel,
        out_shape=jax.ShapeDtypeStruct((b, sq_pad, dv), query.dtype),
        grid_spec=pltpu.PrefetchScalarGridSpec(
            num_scalar_prefetch=0,
            grid=grid,
            in_specs=in_specs,
            out_specs=o_spec,
            scratch_shapes=scratch,
        ),
        compiler_params=compiler_params,
    )(*args)

    if pad_q:
        out3 = out3[:, :sq, :]
    return out3.reshape(*batch_dims, sq, dv)


def _reference_sdpa(query, key, value, mask=None):
    """Pure-JAX reference matching the PyTorch module semantics."""
    dk = query.shape[-1]
    attn = jnp.einsum("...qd,...kd->...qk", query, key) / math.sqrt(dk)
    if mask is not None:
        attn = jnp.where(mask == 0, -jnp.inf, attn)
    attn = attn - jnp.max(attn, axis=-1, keepdims=True)
    e = jnp.exp(attn)
    attn = e / jnp.sum(e, axis=-1, keepdims=True)
    return jnp.einsum("...qk,...kv->...qv", attn, value)


if __name__ == "__main__":
    # Lane-dense shapes: head dim 128 (multiple of 128 lanes), seq 256 (two kv
    # tiles / two q tiles per head, exercising the online-softmax reduction).
    B, H, S, DK, DV = 2, 4, 256, 128, 128
    key0 = jax.random.PRNGKey(0)
    kq, kk, kv = jax.random.split(key0, 3)

    q = jax.random.normal(kq, (B, H, S, DK), dtype=jnp.float32)
    k = jax.random.normal(kk, (B, H, S, DK), dtype=jnp.float32)
    v = jax.random.normal(kv, (B, H, S, DV), dtype=jnp.float32)

    # Causal mask (1 = keep, 0 = mask out), broadcast over batch/heads.
    causal = jnp.tril(jnp.ones((S, S), dtype=jnp.int32))
    mask = jnp.broadcast_to(causal, (B, H, S, S))

    # Masked (causal) case — mask streamed as int8 tiles.
    out_masked = jax.block_until_ready(scaled_dot_product_attention(q, k, v, mask))
    ref_masked = _reference_sdpa(q, k, v, mask)

    # Unmasked case — mask=None fast path, no mask traffic at all.
    out_nomask = jax.block_until_ready(scaled_dot_product_attention(q, k, v, None))
    ref_nomask = _reference_sdpa(q, k, v, None)

    # Ragged case — exercises sequence padding + in-kernel key-padding mask.
    sq_r, sk_r, d_r = 40, 72, 32
    qr = jax.random.normal(kq, (B, H, sq_r, d_r), dtype=jnp.float32)
    kr = jax.random.normal(kk, (B, H, sk_r, d_r), dtype=jnp.float32)
    vr = jax.random.normal(kv, (B, H, sk_r, d_r), dtype=jnp.float32)
    out_r = jax.block_until_ready(scaled_dot_product_attention(qr, kr, vr, None))
    ref_r = _reference_sdpa(qr, kr, vr, None)

    # Tolerance 2e-3: the softmax denominator uses the EUP's approximate
    # reciprocal (pl.reciprocal(approx=True)); everything else is f32-exact.
    tol = dict(atol=2e-3, rtol=2e-3)
    assert out_masked.shape == (B, H, S, DV)
    assert jnp.allclose(out_masked, ref_masked, **tol)
    assert jnp.allclose(out_nomask, ref_nomask, **tol)
    assert jnp.allclose(out_r, ref_r, **tol)

    print("KERNEL_OK")
</pallas_src>

<mosaic_0001>
module attributes {stable_mosaic.version = 11 : i64} {
  func.func @_sdpa_kernel_masked(%arg0: i32, %arg1: i32, %arg2: i32, %arg3: memref<1x128x128xf32, #tpu.memory_space<vmem>>, %arg4: memref<1x256x128xf32, #tpu.memory_space<vmem>>, %arg5: memref<1x256x128xf32, #tpu.memory_space<vmem>>, %arg6: memref<1x128x256xi8, #tpu.memory_space<vmem>>, %arg7: memref<1x128x128xf32, #tpu.memory_space<vmem>>, %arg8: memref<128x1xf32, #tpu.memory_space<vmem>>, %arg9: memref<128x1xf32, #tpu.memory_space<vmem>>, %arg10: memref<128x128xf32, #tpu.memory_space<vmem>>) attributes {dimension_semantics = [#tpu.dimension_semantics<parallel>, #tpu.dimension_semantics<parallel>, #tpu.dimension_semantics<arbitrary>], iteration_bounds = array<i64: 8, 2, 1>, scalar_prefetch = 0 : i64, scratch_operands = 3 : i64, tpu.core_type = #tpu.core_type<tc>, window_params = [{transform_indices = @transform_0, window_bounds = array<i64: 1, 128, 128>}, {transform_indices = @transform_1, window_bounds = array<i64: 1, 256, 128>}, {transform_indices = @transform_2, window_bounds = array<i64: 1, 256, 128>}, {transform_indices = @transform_3, window_bounds = array<i64: 1, 128, 256>}, {transform_indices = @transform_4, window_bounds = array<i64: 1, 128, 128>}]} {
    %c0_i32 = arith.constant 0 : i32
    %0 = arith.cmpi eq, %arg2, %c0_i32 : i32
    %1 = arith.extui %0 : i1 to i32
    %c0_i32_0 = arith.constant 0 : i32
    %2 = arith.cmpi ne, %1, %c0_i32_0 : i32
    scf.if %2 {
      %cst_32 = arith.constant -1.000000e+30 : f32
      %44 = vector.broadcast %cst_32 : f32 to vector<128x1xf32>
      %c0_33 = arith.constant 0 : index
      %c0_34 = arith.constant 0 : index
      %45 = vector.load %arg8[%c0_33, %c0_34] : memref<128x1xf32, #tpu.memory_space<vmem>>, vector<128x1xf32>
      tpu.vector_store %arg8[%c0_33, %c0_34], %44 {strides = array<i32>} : memref<128x1xf32, #tpu.memory_space<vmem>>, vector<128x1xf32>,
      %cst_35 = arith.constant 0.000000e+00 : f32
      %46 = vector.broadcast %cst_35 : f32 to vector<128x1xf32>
      %c0_36 = arith.constant 0 : index
      %c0_37 = arith.constant 0 : index
      %47 = vector.load %arg9[%c0_36, %c0_37] : memref<128x1xf32, #tpu.memory_space<vmem>>, vector<128x1xf32>
      tpu.vector_store %arg9[%c0_36, %c0_37], %46 {strides = array<i32>} : memref<128x1xf32, #tpu.memory_space<vmem>>, vector<128x1xf32>,
      %cst_38 = arith.constant 0.000000e+00 : f32
      %48 = vector.broadcast %cst_38 : f32 to vector<128x128xf32>
      %c0_39 = arith.constant 0 : index
      %c0_40 = arith.constant 0 : index
      %49 = vector.load %arg10[%c0_39, %c0_40] : memref<128x128xf32, #tpu.memory_space<vmem>>, vector<128x128xf32>
      tpu.vector_store %arg10[%c0_39, %c0_40], %48 {strides = array<i32>} : memref<128x128xf32, #tpu.memory_space<vmem>>, vector<128x128xf32>,
    } else {
    }
    %c0 = arith.constant 0 : index
    %c0_1 = arith.constant 0 : index
    %c0_2 = arith.constant 0 : index
    %3 = vector.load %arg3[%c0, %c0_1, %c0_2] : memref<1x128x128xf32, #tpu.memory_space<vmem>>, vector<1x128x128xf32>
    %4 = vector.shape_cast %3 : vector<1x128x128xf32> to vector<128x128xf32>
    %cst = arith.constant 0.0883883461 : f32
    %5 = vector.broadcast %cst : f32 to vector<128x128xf32>
    %6 = arith.mulf %4, %5 : vector<128x128xf32>
    %c0_3 = arith.constant 0 : index
    %c0_4 = arith.constant 0 : index
    %c0_5 = arith.constant 0 : index
    %7 = vector.load %arg4[%c0_3, %c0_4, %c0_5] : memref<1x256x128xf32, #tpu.memory_space<vmem>>, vector<1x256x128xf32>
    %8 = vector.shape_cast %7 : vector<1x256x128xf32> to vector<256x128xf32>
    %cst_6 = arith.constant dense<0.000000e+00> : vector<128x256xf32>
    %9 = tpu.matmul %6, %8, %cst_6 {dimension_numbers = #tpu.dot_dimension_numbers<[1], [1], [0], [0], [0, 0, 1, 0], [], []>} : vector<128x128xf32>, vector<256x128xf32>, vector<128x256xf32> -> vector<128x256xf32>
    %c0_7 = arith.constant 0 : index
    %c0_8 = arith.constant 0 : index
    %c0_9 = arith.constant 0 : index
    %10 = vector.load %arg6[%c0_7, %c0_8, %c0_9] : memref<1x128x256xi8, #tpu.memory_space<vmem>>, vector<1x128x256xi8>
    %11 = vector.shape_cast %10 : vector<1x128x256xi8> to vector<128x256xi8>
    %12 = arith.extsi %11 : vector<128x256xi8> to vector<128x256xi32>
    %c0_i32_10 = arith.constant 0 : i32
    %13 = vector.broadcast %c0_i32_10 : i32 to vector<128x256xi32>
    %14 = arith.cmpi eq, %12, %13 : vector<128x256xi32>
    %cst_11 = arith.constant -1.000000e+30 : f32
    %15 = vector.broadcast %cst_11 : f32 to vector<128x256xf32>
    %16 = arith.select %14, %15, %9 : vector<128x256xi1>, vector<128x256xf32>
    %c0_12 = arith.constant 0 : index
    %c0_13 = arith.constant 0 : index
    %17 = vector.load %arg8[%c0_12, %c0_13] : memref<128x1xf32, #tpu.memory_space<vmem>>, vector<128x1xf32>
    %cst_14 = arith.constant dense<0xFF800000> : vector<128xf32>
    %18 = vector.multi_reduction <maximumf>, %16, %cst_14 [1] : vector<128x256xf32> to vector<128xf32>
    %19 = vector.shape_cast %18 : vector<128xf32> to vector<128x1xf32>
    %20 = arith.maximumf %17, %19 : vector<128x1xf32>
    %21 = arith.subf %17, %20 : vector<128x1xf32>
    %22 = math.exp %21 : vector<128x1xf32>
    %23 = vector.broadcast %20 : vector<128x1xf32> to vector<128x256xf32>
    %24 = arith.subf %16, %23 : vector<128x256xf32>
    %25 = math.exp %24 : vector<128x256xf32>
    %c0_15 = arith.constant 0 : index
    %c0_16 = arith.constant 0 : index
    %26 = vector.load %arg9[%c0_15, %c0_16] : memref<128x1xf32, #tpu.memory_space<vmem>>, vector<128x1xf32>
    %27 = arith.mulf %22, %26 : vector<128x1xf32>
    %cst_17 = arith.constant dense<0.000000e+00> : vector<128xf32>
    %28 = vector.multi_reduction <add>, %25, %cst_17 [1] : vector<128x256xf32> to vector<128xf32>
    %29 = vector.shape_cast %28 : vector<128xf32> to vector<128x1xf32>
    %30 = arith.addf %27, %29 : vector<128x1xf32>
    %c0_18 = arith.constant 0 : index
    %c0_19 = arith.constant 0 : index
    %31 = vector.load %arg9[%c0_18, %c0_19] : memref<128x1xf32, #tpu.memory_space<vmem>>, vector<128x1xf32>
    tpu.vector_store %arg9[%c0_18, %c0_19], %30 {strides = array<i32>} : memref<128x1xf32, #tpu.memory_space<vmem>>, vector<128x1xf32>,
    %c0_20 = arith.constant 0 : index
    %c0_21 = arith.constant 0 : index
    %32 = vector.load %arg10[%c0_20, %c0_21] : memref<128x128xf32, #tpu.memory_space<vmem>>, vector<128x128xf32>
    %33 = vector.broadcast %22 : vector<128x1xf32> to vector<128x128xf32>
    %34 = arith.mulf %33, %32 : vector<128x128xf32>
    %c0_22 = arith.constant 0 : index
    %c0_23 = arith.constant 0 : index
    %c0_24 = arith.constant 0 : index
    %35 = vector.load %arg5[%c0_22, %c0_23, %c0_24] : memref<1x256x128xf32, #tpu.memory_space<vmem>>, vector<1x256x128xf32>
    %36 = vector.shape_cast %35 : vector<1x256x128xf32> to vector<256x128xf32>
    %cst_25 = arith.constant dense<0.000000e+00> : vector<128x128xf32>
    %37 = tpu.matmul %25, %36, %cst_25 {dimension_numbers = #tpu.dot_dimension_numbers<[1], [0], [0], [1], [0, 0, 1, 1], [], []>} : vector<128x256xf32>, vector<256x128xf32>, vector<128x128xf32> -> vector<128x128xf32>
    %38 = arith.addf %34, %37 : vector<128x128xf32>
    %c0_26 = arith.constant 0 : index
    %c0_27 = arith.constant 0 : index
    %39 = vector.load %arg10[%c0_26, %c0_27] : memref<128x128xf32, #tpu.memory_space<vmem>>, vector<128x128xf32>
    tpu.vector_store %arg10[%c0_26, %c0_27], %38 {strides = array<i32>} : memref<128x128xf32, #tpu.memory_space<vmem>>, vector<128x128xf32>,
    %c0_28 = arith.constant 0 : index
    %c0_29 = arith.constant 0 : index
    %40 = vector.load %arg8[%c0_28, %c0_29] : memref<128x1xf32, #tpu.memory_space<vmem>>, vector<128x1xf32>
    tpu.vector_store %arg8[%c0_28, %c0_29], %20 {strides = array<i32>} : memref<128x1xf32, #tpu.memory_space<vmem>>, vector<128x1xf32>,
    %c0_i32_30 = arith.constant 0 : i32
    %41 = arith.cmpi eq, %arg2, %c0_i32_30 : i32
    %42 = arith.extui %41 : i1 to i32
    %c0_i32_31 = arith.constant 0 : i32
    %43 = arith.cmpi ne, %42, %c0_i32_31 : i32
    scf.if %43 {
      %c0_32 = arith.constant 0 : index
      %c0_33 = arith.constant 0 : index
      %44 = vector.load %arg9[%c0_32, %c0_33] : memref<128x1xf32, #tpu.memory_space<vmem>>, vector<128x1xf32>
      %45 = tpu.reciprocal %44 {approx = true} : vector<128x1xf32> -> vector<128x1xf32>
      %c0_34 = arith.constant 0 : index
      %c0_35 = arith.constant 0 : index
      %46 = vector.load %arg10[%c0_34, %c0_35] : memref<128x128xf32, #tpu.memory_space<vmem>>, vector<128x128xf32>
      %47 = vector.broadcast %45 : vector<128x1xf32> to vector<128x128xf32>
      %48 = arith.mulf %46, %47 : vector<128x128xf32>
      %c0_36 = arith.constant 0 : index
      %c0_37 = arith.constant 0 : index
      %c0_38 = arith.constant 0 : index
      %49 = vector.load %arg7[%c0_36, %c0_37, %c0_38] : memref<1x128x128xf32, #tpu.memory_space<vmem>>, vector<1x128x128xf32>
      %50 = vector.shape_cast %49 : vector<1x128x128xf32> to vector<128x128xf32>
      %51 = vector.shape_cast %48 : vector<128x128xf32> to vector<1x128x128xf32>
      tpu.vector_store %arg7[%c0_36, %c0_37, %c0_38], %51 {strides = array<i32>} : memref<1x128x128xf32, #tpu.memory_space<vmem>>, vector<1x128x128xf32>,
    } else {
    }
    return
  }
  func.func @transform_0(%arg0: i32, %arg1: i32, %arg2: i32) -> (i32, i32, i32) {
    %c0_i32 = arith.constant 0 : i32
    %c0_i32_0 = arith.constant 0 : i32
    return %arg0, %arg1, %c0_i32 : i32, i32, i32
  }
  func.func @transform_1(%arg0: i32, %arg1: i32, %arg2: i32) -> (i32, i32, i32) {
    %c0_i32 = arith.constant 0 : i32
    %c0_i32_0 = arith.constant 0 : i32
    return %arg0, %arg2, %c0_i32 : i32, i32, i32
  }
  func.func @transform_2(%arg0: i32, %arg1: i32, %arg2: i32) -> (i32, i32, i32) {
    %c0_i32 = arith.constant 0 : i32
    %c0_i32_0 = arith.constant 0 : i32
    return %arg0, %arg2, %c0_i32 : i32, i32, i32
  }
  func.func @transform_3(%arg0: i32, %arg1: i32, %arg2: i32) -> (i32, i32, i32) {
    %c0_i32 = arith.constant 0 : i32
    return %arg0, %arg1, %arg2 : i32, i32, i32
  }
  func.func @transform_4(%arg0: i32, %arg1: i32, %arg2: i32) -> (i32, i32, i32) {
    %c0_i32 = arith.constant 0 : i32
    %c0_i32_0 = arith.constant 0 : i32
    return %arg0, %arg1, %c0_i32 : i32, i32, i32
  }
}

</mosaic_0001>

<bundles_post_ra>
// kernel: scaled_dot_product_attention.1
= control target key start
LH: loop header
LB: loop body
LE: loop exit
PB: predicated region body
PF: predicated region fallthrough
CT: control target
= control target key end

     0   :  { %9 = vsyncpa [#allocation6], 0  ;;  %s3369_s0 = inlined_call_operand.vmem [shape: f32[8,256,128], index: 0, kind: input, shape index: {}]   ;;  %s3370_s1 = inlined_call_operand.vmem [shape: f32[8,256,128], index: 1, kind: input, shape index: {}]   ;;  %s3371_s2 = inlined_call_operand.hbm [shape: f32[8,256,128], index: 2, kind: input, shape index: {}]   ;;  %s3372_s3 = inlined_call_operand.vmem [shape: s8[8,256,256], index: 3, kind: input, shape index: {}]   ;;  %s3373_s4 = inlined_call_operand.hbm [shape: f32[8,256,128], index: 4, kind: output, shape index: {}]  }
   0x1   :  { %11 = vsyncpa [#allocation6 + $0x1], 0 }
   0x2   :  { %12 = vsyncpa [#allocation7], 0 }
   0x3   :  { %14 = vsyncpa [#allocation7 + $0x1], 0  ;;  %s2500_s15 = smov 0   ;;  %s2502_s16 = smov 0  }
   0x4   :  { %s2504_s17 = smov 0   ;;  %s2506_s18 = smov 0  }
   0x5   :  { %s2508_s19 = smov 0   ;;  %s2510_s20 = smov 0  }
   0x6   :  { %s2512_s21 = smov 0   ;;  %s2514_s22 = smov 0  }
   0x7   :  { %s2516_s23 = smov 0   ;;  %s2518_s24 = smov 0  }
   0x8   :  { %s2520_s25 = smov 0  }
   0x9 LB: > { %s1838_s26 = sadd.s32 4294967295, %s2464_s25   ;;  %s1839_s27 = sadd.s32 4294967294, %s2464_s25   ;;  %s2464_s25 = sphi %s2520_s25, %s20_s25   ;;  %s2460_s24 = sphi %s2518_s24, %s3455_s24   ;;  %s2456_s23 = sphi %s2516_s23, %s3454_s23   ;;  %s2452_s22 = sphi %s2514_s22, %s3453_s22   ;;  %s2448_s21 = sphi %s2512_s21, %s3452_s21   ;;  %s2444_s20 = sphi %s2510_s20, %s3451_s20   ;;  %s2440_s19 = sphi %s2508_s19, %s3450_s19   ;;  %s2436_s18 = sphi %s2506_s18, %s3449_s18   ;;  %s2432_s17 = sphi %s2504_s17, %s3448_s17   ;;  %s2428_s16 = sphi %s2502_s16, %s3447_s16   ;;  %s2424_s15 = sphi %s2500_s15, %s3446_s15  }
   0xa   : > { %s35_s28 = sadd.s32 1, %s2456_s23  ;;  %s39_s29 = sadd.s32 1, %s2460_s24 }
   0xb   : > { %p37_p0 = scmp.ge.s32.totalorder %s35_s28, 2  ;;  %s104_s30 = sadd.s32 1, %s2444_s20 }
   0xc   : > { %p111_p1 = scmp.ne.s32.totalorder %s2444_s20, %s2440_s19  ;;  %p112_p2 = scmp.eq.s32.totalorder %s2464_s25, 0 }
   0xd   : > { %s3457_s28 = smov (%p37_p0, %s35_s28), 0  ;;  %s3459_s29 = smov (!%p37_p0, %s39_s29), %s2460_s24 }
   0xe   : > { %3390 = sst [smem:[#allocation11_spill]] %s3457_s28  ;;  %p2564_p3 = por %p112_p2, %p111_p1 }
   0xf   : > { %p117_p4 = scmp.ne.s32.totalorder %s2440_s19, %s2436_s18  ;;  %p41_p5 = scmp.ge.s32.totalorder %s3459_s29, 8 }
  0x10   : > { %p118_p6 = scmp.eq.s32.totalorder %s1838_s26, 0  ;;  %s158_s6 = ssub.s32 %s2456_s23, %s3457_s28 }
  0x11   : > { %s162_s7 = sadd.s32 1, %s2432_s17  ;;  %s3461_s29 = smov (%p41_p5, %s3459_s29), 0 }
  0x12   : > { %3392 = sst [smem:[#allocation12_spill]] %s3461_s29  ;;  %p2574_p7 = por %p118_p6, %p117_p4 }
  0x13   : > { %p172_p8 = scmp.ne.s32.totalorder %s2432_s17, %s2428_s16  ;;  %s99_s9 = ssub.s32 %s2460_s24, %s3461_s29 }
  0x14   : > { %p173_p9 = scmp.eq.s32.totalorder %s1838_s26, 15  ;;  %p102_p10 = scmp.eq.s32.totalorder %s99_s9, 0 }
  0x15   : > { %s159_s10 = sor.u32 %s158_s6, %s99_s9  ;;  %p178_p13 = scmp.ne.s32.totalorder %s2428_s16, %s2424_s15 }
  0x16   : > { %p160_p11 = scmp.eq.s32.totalorder %s159_s10, 0  ;;  %p2582_p12 = por %p173_p9, %p172_p8 }
  0x17   : > { %s2587_s12 = scalar_select %p102_p10, %s2444_s20, %s104_s30  }
  0x18   : > { %s3394_s11 = scalar_select %p2582_p12, 1, 0 }
  0x19   : > { %s2590_s13 = scalar_select %p160_p11, %s2432_s17, %s162_s7  }
  0x1a   : > { %p179_p0 = scmp.eq.s32.totalorder %s1839_s27, 15  ;;  %p2085_p1 = scmp.lt.s32.totalorder %s2464_s25, 16 }
  0x1b   : > { %s225_s18 = sand.u32 1, %s2444_s20   ;;  %s1863_s6 = sshll.u32 %s2460_s24, 12 }
  0x1c   : > { %p2595_p2 = por %p179_p0, %p178_p13  ;;  %s1842_s26 = sshll.u32 %s225_s18, 8 }
  0x1d   : > { %s2604_s29 = scalar_lea.hbm %s3371_s2, %s1863_s6  ;;  %s229_s30 = scalar_lea.vmem [#allocation5], %s1842_s26 }
  0x1e   : > { %s3395_s14 = scalar_select %p2595_p2, 1, 0 }
  0x1f   : > { %s238_s7 = sshll.u32 %s229_s30, 4  ;;  %p2610_p4 = pnand %p2085_p1, %p2564_p3  ;;  %s2606_s7 = int_to_ptr.vmem [resolvable:$true] %s238_s7 }
  0x20   : > { %s2615_s28 = scalar_lea.sflag [#allocation6], %s225_s18  ;;  %s2312_s6 = scalar_lea.hbm %s2604_s29, 4096 }
  0x21   : > { %p2313_p6 = scmp.ne.s32.totalorder %s2604_s29, %s2312_s6  ;;  %p2314_p8 = pneg %p2610_p4 }
  0x22   : > { %s2317_s5 = scalar_lea.hbm %s3371_s2, 32768  ;;  %p2318_p3 = scmp.lt.u32.totalorder %s2604_s29, %s3371_s2 }
  0x23   : > { %p2315_p9 = pnand %p2314_p8, %p2313_p6  ;;  %p2319_p11 = scmp.lt.u32.totalorder %s2317_s5, %s2312_s6 }
  0x24   : > { %p2321_p0 = scmp.lt.u32.totalorder %s2312_s6, %s2604_s29 }
  0x25   : > { %p2316_p10 = pneg %p2315_p9  ;;  %p2320_p13 = por %p2319_p11, %p2318_p3 }
  0x27   : > { %p2322_p1 = por %p2321_p0, %p2320_p13 }
  0x29   : > { %p2323_p5 = pnand %p2322_p1, %p2316_p10 }
  0x2b   : > { %2326 = shalt.err (!%p2323_p5)
}
  0x2c   : > { %s2327_s18 = scalar_lea.vmem %s2606_s7, 4096  ;;  %s2466_s26 = smov [#allocation5]  }
  0x2d   : > { %p2328_p6 = scmp.ne.s32.totalorder %s2606_s7, %s2327_s18  ;;  %s2332_s9 = sshll.u32 %s2466_s26, 4  ;;  %s2333_s9 = int_to_ptr.vmem [resolvable:$false] %s2332_s9 }
  0x2e   : > { %s2334_s10 = scalar_lea.vmem %s2333_s9, 8192  ;;  %p2335_p12 = scmp.lt.s32.totalorder %s2606_s7, %s2333_s9 }
  0x2f   : > { %p2330_p9 = pnand %p2328_p6, %p2314_p8  ;;  %p2336_p3 = scmp.lt.s32.totalorder %s2334_s10, %s2327_s18 }
  0x31   : > { %p2331_p2 = pneg %p2330_p9  ;;  %p2337_p11 = por %p2336_p3, %p2335_p12 }
  0x33   : > { %p2338_p13 = pnand %p2337_p11, %p2331_p2 }
  0x35   : > { %2341 = shalt.err (!%p2338_p13)
}
  0x36   : > { %s2467_s6 = smov 128   ;;  %s2468_s5 = smov 8  }
  0x37   : > { %2080 = dma.hbm_to_vmem [thread:$0]  (!%p2610_p4), %s2604_s29, 4096, %s2606_s7, %s2615_s28, %s2467_s6, %s2467_s6, %s2468_s5  }
  0x38   : > { %p265_p5 = scmp.lt.s32.totalorder %s2464_s25, 17  ;;  %p3397_p8 = scmp.ge.s32.totalorder %s2464_s25, 1 }
  0x3a   : > { %p266_p10 = pnand %p3397_p8, %p265_p5 }
  0x3c   : > { %269 = sbr.rel (%p266_p10) target bundleno = 1018 (0x3fa), region = 36 }
  0x43   : > { %s271_s30 = sand.u32 1, %s2440_s19  }
  0x44   : > { %s1846_s18 = sshll.u32 %s271_s30, 8  ;;  %s272_s26 = scalar_lea.sflag [#allocation6], %s271_s30 }
  0x45   : > { %s2647_s9 = scalar_lea.vmem [#allocation5], %s1846_s18 }
  0x46   : > { %2415 = dma.done.wait (%p2574_p7), %s272_s26, 4096  }
  0x47   : > { %2417 = vsyncadd (%p2574_p7), %s272_s26, 4294963200  ;;  %p333_p12 = scmp.lt.s32.totalorder %s2452_s22, 7  ;;  %s2655_s28 = sshll.u32 %s2448_s21, 4  ;;  %vm374_vm0 = vcmask 7168  }
  0x48   : > { %p335_p2 = scmp.lt.s32.totalorder %s2655_s28, 31  ;;  %p3442_p0 = scmp.ne.s32.totalorder %s3394_s11, 0 }
  0x49   : > { %s2659_s29 = scalar_select %p333_p12, %s2452_s22, 7 }
  0x4a   : > { %s336_s7 = scalar_select %p335_p2, %s2655_s28, 31 }
  0x4b   : > { %s1864_s27 = sshll.u32 %s2659_s29, 8  ;;  %s1849_s5 = sshll.u32 %s2659_s29, 5 }
  0x4c   : > { %s2666_s8 = scalar_lea.vmem %s3370_s1, %s1864_s27  ;;  %s338_s30 = sadd.s32 %s1849_s5, %s336_s7 }
  0x4d   : > { %v471_v0 = vld [vmem:[%s2666_s8 + $0x80] sm:$0xff]  ;;  %v472_v1 = vld [vmem:[%s2666_s8 + $0x88] sm:$0xff]  ;;  %v473_v5 = vld [vmem:[%s2666_s8 + $0x90] sm:$0xff]  ;;  %s1850_s18 = sshll.u32 %s338_s30, 3  ;;  %s1853_s7 = sshll.u32 %s2448_s21, 2 }
  0x4e   : > { %v455_v2 = vld [vmem:[%s2666_s8] sm:$0xff]  ;;  %v2009_v3 = vpack.c.bf16 %v472_v1, %v471_v0  ;;  %v456_v4 = vld [vmem:[%s2666_s8 + $0x8] sm:$0xff]  ;;  %v474_v6 = vld [vmem:[%s2666_s8 + $0x98] sm:$0xff]  ;;  %s2682_s10 = scalar_lea.vmem %s3369_s0, %s1850_s18  ;;  %p357_p7 = scmp.lt.s32.totalorder %s1853_s7, 7 }
  0x4f   : > { %v2011_v7 = vpack.c.bf16 %v456_v4, %v455_v2  ;;  %v2013_v8 = vpack.c.bf16 %v474_v6, %v473_v5  ;;  %v457_v9 = vld [vmem:[%s2666_s8 + $0x10] sm:$0xff]  ;;  %v458_v10 = vld [vmem:[%s2666_s8 + $0x18] sm:$0xff]  ;;  %v475_v11 = vld [vmem:[%s2666_s8 + $0xa0] sm:$0xff]  ;;  %s329_s21 = sand.u32 1, %s2428_s16   ;;  %s2472_s26 = smov [#allocation8]  }
  0x50   : > { %2010 = vmatprep.subr.bf16.mxu0 %v2009_v3  ;;  %v476_v12 = vld [vmem:[%s2666_s8 + $0xa8] sm:$0xff]  ;;  %v2015_v13 = vpack.c.bf16 %v458_v10, %v457_v9  ;;  %v423_v15 = vld [vmem:[%s2682_s10] sm:$0xff]  ;;  %v477_v19 = vld [vmem:[%s2666_s8 + $0xb0] sm:$0xff]  ;;  %s3463_s7 = smov (!%p357_p7, %s1853_s7), 7 }
  0x51   : > { %2012 = vmatpush3.bf16.xpose.msra.mxu0 %v2011_v7  ;;  %v2017_v14 = vpack.c.bf16 %v476_v12, %v475_v11  ;;  %v439_v16 = vmul.f32 0.088388346, %v423_v15  ;;  %v459_v17 = vld [vmem:[%s2666_s8 + $0x20] sm:$0xff]  ;;  %v460_v18 = vld [vmem:[%s2666_s8 + $0x28] sm:$0xff]  ;;  %v478_v20 = vld [vmem:[%s2666_s8 + $0xb8] sm:$0xff]  ;;  %s1854_s6 = sshll.u32 %s3463_s7, 1 }
  0x52   : > { %2014 = vmatprep.subr.bf16.mxu0 %v2013_v8  ;;  %v2019_v21 = vpack.c.bf16 %v460_v18, %v459_v17  ;;  %v2021_v22 = vpack.c.bf16 %v478_v20, %v477_v19  ;;  %v461_v23 = vld [vmem:[%s2666_s8 + $0x30] sm:$0xff]  ;;  %v462_v24 = vld [vmem:[%s2666_s8 + $0x38] sm:$0xff]  ;;  %v479_v25 = vld [vmem:[%s2666_s8 + $0xc0] sm:$0xff] }
  0x53   : > { %1897 = vmatprep.mubr.f32.mxu0 %v439_v16  ;;  %v480_v26 = vld [vmem:[%s2666_s8 + $0xc8] sm:$0xff]  ;;  %v2023_v27 = vpack.c.bf16 %v462_v24, %v461_v23  ;;  %v463_v29 = vld [vmem:[%s2666_s8 + $0x40] sm:$0xff]  ;;  %v481_v31 = vld [vmem:[%s2666_s8 + $0xd0] sm:$0xff] }
  0x54   : > { %v2025_v28 = vpack.c.bf16 %v480_v26, %v479_v25  ;;  %v464_v30 = vld [vmem:[%s2666_s8 + $0x48] sm:$0xff]  ;;  %v482_v32 = vld [vmem:[%s2666_s8 + $0xd8] sm:$0xff]  ;;  %v465_v35 = vld [vmem:[%s2666_s8 + $0x50] sm:$0xff] }
  0x55   : > { %v2027_v33 = vpack.c.bf16 %v464_v30, %v463_v29  ;;  %v2029_v34 = vpack.c.bf16 %v482_v32, %v481_v31  ;;  %v466_v36 = vld [vmem:[%s2666_s8 + $0x58] sm:$0xff]  ;;  %v483_v37 = vld [vmem:[%s2666_s8 + $0xe0] sm:$0xff]  ;;  %v484_v38 = vld [vmem:[%s2666_s8 + $0xe8] sm:$0xff] }
  0x56   : > { %v2031_v39 = vpack.c.bf16 %v466_v36, %v465_v35  ;;  %v2033_v40 = vpack.c.bf16 %v484_v38, %v483_v37  ;;  %v467_v41 = vld [vmem:[%s2666_s8 + $0x60] sm:$0xff]  ;;  %v468_v42 = vld [vmem:[%s2666_s8 + $0x68] sm:$0xff]  ;;  %v485_v43 = vld [vmem:[%s2666_s8 + $0xf0] sm:$0xff] }
  0x57   : > { %v486_v44 = vld [vmem:[%s2666_s8 + $0xf8] sm:$0xff]  ;;  %v2035_v45 = vpack.c.bf16 %v468_v42, %v467_v41  ;;  %v469_v47 = vld [vmem:[%s2666_s8 + $0x70] sm:$0xff]  ;;  %v424_v50 = vld [vmem:[%s2682_s10 + $0x8] sm:$0xff] }
  0x58   : > { %v2037_v46 = vpack.c.bf16 %v486_v44, %v485_v43  ;;  %v470_v48 = vld [vmem:[%s2666_s8 + $0x78] sm:$0xff]  ;;  %v440_v51 = vmul.f32 0.088388346, %v424_v50  ;;  %v425_v52 = vld [vmem:[%s2682_s10 + $0x10] sm:$0xff]  ;;  %v427_v56 = vld [vmem:[%s2682_s10 + $0x20] sm:$0xff]  ;;  %s1855_s8 = sshll.u32 %s2659_s29, 4 }
  0x59   : > { %2016 = vmatpush3.bf16.xpose.msra.mxu0 %v2015_v13  ;;  %v2039_v49 = vpack.c.bf16 %v470_v48, %v469_v47  ;;  %v441_v53 = vmul.f32 0.088388346, %v425_v52  ;;  %v426_v54 = vld [vmem:[%s2682_s10 + $0x18] sm:$0xff]  ;;  %v443_v57 = vmul.f32 0.088388346, %v427_v56  ;;  %v428_v58 = vld [vmem:[%s2682_s10 + $0x28] sm:$0xff]  ;;  %s364_s5 = sadd.s32 %s1855_s8, %s1854_s6 }
  0x5a   : > { %2018 = vmatprep.subr.bf16.mxu0 %v2017_v14  ;;  %v442_v55 = vmul.f32 0.088388346, %v426_v54  ;;  %v444_v59 = vmul.f32 0.088388346, %v428_v58  ;;  %v429_v60 = vld [vmem:[%s2682_s10 + $0x30] sm:$0xff]  ;;  %v430_v62 = vld [vmem:[%s2682_s10 + $0x38] sm:$0xff] }
  0x5b   : > { %v445_v61 = vmul.f32 0.088388346, %v429_v60  ;;  %v446_v63 = vmul.f32 0.088388346, %v430_v62  ;;  %v431_v0 = vld [vmem:[%s2682_s10 + $0x40] sm:$0xff]  ;;  %v432_v2 = vld [vmem:[%s2682_s10 + $0x48] sm:$0xff] }
  0x5c   : > { %v447_v1 = vmul.f32 0.088388346, %v431_v0  ;;  %v448_v3 = vmul.f32 0.088388346, %v432_v2  ;;  %v433_v4 = vld [vmem:[%s2682_s10 + $0x50] sm:$0xff]  ;;  %v434_v6 = vld [vmem:[%s2682_s10 + $0x58] sm:$0xff] }
  0x5d   : > { %v449_v5 = vmul.f32 0.088388346, %v433_v4  ;;  %v450_v7 = vmul.f32 0.088388346, %v434_v6  ;;  %v435_v8 = vld [vmem:[%s2682_s10 + $0x60] sm:$0xff]  ;;  %v436_v10 = vld [vmem:[%s2682_s10 + $0x68] sm:$0xff] }
  0x5e   : > { %v451_v9 = vmul.f32 0.088388346, %v435_v8  ;;  %v452_v11 = vmul.f32 0.088388346, %v436_v10  ;;  %v437_v12 = vld [vmem:[%s2682_s10 + $0x70] sm:$0xff]  ;;  %v438_v14 = vld [vmem:[%s2682_s10 + $0x78] sm:$0xff] }
  0x5f   : > { %v453_v13 = vmul.f32 0.088388346, %v437_v12  ;;  %v454_v15 = vmul.f32 0.088388346, %v438_v14  ;;  %s1856_s30 = sshll.u32 %s364_s5, 3  ;;  %s1859_s10 = sshll.u32 %s2452_s22, 5 }
  0x60   : > { %s2743_s27 = scalar_lea.vmem %s3372_s3, %s1856_s30  ;;  %s1682_s7 = sadd.s32 %s1859_s10, %s2655_s28 }
  0x61   : > { %2020 = vmatpush3.bf16.xpose.msra.mxu0 %v2019_v21  ;;  %v648_v17 = vld [vmem:[%s2743_s27] sm:$0xff]  ;;  %v649_v18 = vld [vmem:[%s2743_s27 + $0x8] sm:$0xff]  ;;  %v650_v37 = vld [vmem:[%s2743_s27 + $0x10] sm:$0xff]  ;;  %s1860_s6 = sshll.u32 %s1682_s7, 7  ;;  %s3308_s28 = scalar_lea.sflag [#allocation7], %s329_s21 }
  0x62   : > { %2022 = vmatprep.subr.bf16.mxu0 %v2021_v22  ;;  %v656_v19 = vunpack.c.0.s8 %v648_v17  ;;  %v657_v20 = vunpack.c.0.s8 %v649_v18  ;;  %v658_v21 = vunpack.c.1.s8 %v648_v17  ;;  %v659_v22 = vunpack.c.1.s8 %v649_v18  ;;  %v2786_v4 = vld [vmem:[%s2743_s27 + $0x20] sm:$0xff]  ;;  %v2789_v6 = vld [vmem:[%s2743_s27 + $0x28] sm:$0xff]  ;;  %s3299_s30 = scalar_lea.hbm %s3373_s4, %s1860_s6 }
  0x63   : > { %v661_v29 = vunpack.c.2.s8 %v649_v18  ;;  %v663_v36 = vunpack.c.3.s8 %v649_v18  ;;  %v664_v43 = vunpack.c.0.s8 %v650_v37  ;;  %v666_v50 = vunpack.c.1.s8 %v650_v37 }
  0x64   : > { %vm688_vm1 = vcmp.eq.s32.totalorder %v656_v19, 0  ;;  %vm689_vm2 = vcmp.eq.s32.totalorder %v657_v20, 0  ;;  %vm690_vm3 = vcmp.eq.s32.totalorder %v658_v21, 0  ;;  %vm691_vm4 = vcmp.eq.s32.totalorder %v659_v22, 0 }
  0x65   : > { %vm693_vm6 = vcmp.eq.s32.totalorder %v661_v29, 0  ;;  %vm695_vm8 = vcmp.eq.s32.totalorder %v663_v36, 0  ;;  %vm696_vm9 = vcmp.eq.s32.totalorder %v664_v43, 0  ;;  %vm698_vm11 = vcmp.eq.s32.totalorder %v666_v50, 0 }
  0x66   : > { %v672_v10 = vunpack.c.0.s8 %v2786_v4  ;;  %v674_v19 = vunpack.c.1.s8 %v2786_v4  ;;  %v675_v21 = vunpack.c.1.s8 %v2789_v6 }
  0x69   : > { %2024 = vmatpush3.bf16.xpose.msra.mxu0 %v2023_v27  ;;  %v660_v27 = vunpack.c.2.s8 %v648_v17 }
  0x6a   : > { %2026 = vmatprep.subr.bf16.mxu0 %v2025_v28 }
  0x6b   : > { %vm692_vm5 = vcmp.eq.s32.totalorder %v660_v27, 0 }
  0x71   : > { %2028 = vmatpush3.bf16.xpose.msra.mxu0 %v2027_v33 }
  0x72   : > { %2030 = vmatprep.subr.bf16.mxu0 %v2029_v34  ;;  %v662_v34 = vunpack.c.3.s8 %v648_v17  ;;  %v2471_v17 = vmov 0.0  }
  0x73   : > { %391 = vst.msk [vmem:[#allocation3] sm:$0xff] %vm374_vm0, %v2471_v17  ;;  %392 = vst.msk [vmem:[#allocation3 + $0x8] sm:$0xff] %vm374_vm0, %v2471_v17 }
  0x74   : > { %vm694_vm7 = vcmp.eq.s32.totalorder %v662_v34, 0  ;;  %393 = vst.msk [vmem:[#allocation3 + $0x10] sm:$0xff] %vm374_vm0, %v2471_v17  ;;  %394 = vst.msk [vmem:[#allocation3 + $0x18] sm:$0xff] %vm374_vm0, %v2471_v17 }
  0x75   : > { %395 = vst.msk [vmem:[#allocation3 + $0x20] sm:$0xff] %vm374_vm0, %v2471_v17  ;;  %396 = vst.msk [vmem:[#allocation3 + $0x28] sm:$0xff] %vm374_vm0, %v2471_v17 }
  0x76   : > { %397 = vst.msk [vmem:[#allocation3 + $0x30] sm:$0xff] %vm374_vm0, %v2471_v17  ;;  %398 = vst.msk [vmem:[#allocation3 + $0x38] sm:$0xff] %vm374_vm0, %v2471_v17 }
  0x77   : > { %399 = vst.msk [vmem:[#allocation3 + $0x40] sm:$0xff] %vm374_vm0, %v2471_v17  ;;  %400 = vst.msk [vmem:[#allocation3 + $0x48] sm:$0xff] %vm374_vm0, %v2471_v17 }
  0x78   : > { %401 = vst.msk [vmem:[#allocation3 + $0x50] sm:$0xff] %vm374_vm0, %v2471_v17  ;;  %402 = vst.msk [vmem:[#allocation3 + $0x58] sm:$0xff] %vm374_vm0, %v2471_v17 }
  0x79   : > { %2032 = vmatpush3.bf16.xpose.msra.mxu0 %v2031_v39  ;;  %v651_v39 = vld [vmem:[%s2743_s27 + $0x18] sm:$0xff]  ;;  %403 = vst.msk [vmem:[#allocation3 + $0x60] sm:$0xff] %vm374_vm0, %v2471_v17  ;;  %404 = vst.msk [vmem:[#allocation3 + $0x68] sm:$0xff] %vm374_vm0, %v2471_v17 }
  0x7a   : > { %2034 = vmatprep.subr.bf16.mxu0 %v2033_v40  ;;  %v667_v52 = vunpack.c.1.s8 %v651_v39  ;;  %405 = vst.msk [vmem:[#allocation3 + $0x70] sm:$0xff] %vm374_vm0, %v2471_v17  ;;  %406 = vst.msk [vmem:[#allocation3 + $0x78] sm:$0xff] %vm374_vm0, %v2471_v17 }
  0x7c   : > { %vm699_vm12 = vcmp.eq.s32.totalorder %v667_v52, 0 }
  0x81   : > { %2036 = vmatpush3.bf16.xpose.msra.mxu0 %v2035_v45  ;;  %v665_v45 = vunpack.c.0.s8 %v651_v39 }
  0x82   : > { %2038 = vmatprep.subr.bf16.mxu0 %v2037_v46 }
  0x83   : > { %vm697_vm10 = vcmp.eq.s32.totalorder %v665_v45, 0 }
  0x89   : > { %2040 = vmatpush3.bf16.xpose.msra.mxu0 %v2039_v49 }
  0x90   : > { %1898 = vmatmul.mubr.f32.vlgmr.msra.gmra.mrb[0].mxu0 %v439_v16  ;;  %v2469_v16 = vmov -1e+30  }
  0x91   : > { %1899 = vmatprep.mubr.f32.mxu0 %v440_v51  ;;  %375 = vst.msk [vmem:[#allocation2] sm:$0xff] %vm374_vm0, %v2469_v16  ;;  %376 = vst.msk [vmem:[#allocation2 + $0x8] sm:$0xff] %vm374_vm0, %v2469_v16 }
  0x92   : > { %377 = vst.msk [vmem:[#allocation2 + $0x10] sm:$0xff] %vm374_vm0, %v2469_v16  ;;  %378 = vst.msk [vmem:[#allocation2 + $0x18] sm:$0xff] %vm374_vm0, %v2469_v16 }
  0x93   : > { %379 = vst.msk [vmem:[#allocation2 + $0x20] sm:$0xff] %vm374_vm0, %v2469_v16  ;;  %380 = vst.msk [vmem:[#allocation2 + $0x28] sm:$0xff] %vm374_vm0, %v2469_v16 }
  0x94   : > { %1900 = vmatmul.mubr.f32.gmra.mrb[2].mxu0 %v440_v51  ;;  %381 = vst.msk [vmem:[#allocation2 + $0x30] sm:$0xff] %vm374_vm0, %v2469_v16  ;;  %382 = vst.msk [vmem:[#allocation2 + $0x38] sm:$0xff] %vm374_vm0, %v2469_v16 }
  0x95   : > { %1901 = vmatprep.mubr.f32.mxu0 %v441_v53  ;;  %383 = vst.msk [vmem:[#allocation2 + $0x40] sm:$0xff] %vm374_vm0, %v2469_v16  ;;  %384 = vst.msk [vmem:[#allocation2 + $0x48] sm:$0xff] %vm374_vm0, %v2469_v16 }
  0x96   : > { %385 = vst.msk [vmem:[#allocation2 + $0x50] sm:$0xff] %vm374_vm0, %v2469_v16  ;;  %386 = vst.msk [vmem:[#allocation2 + $0x58] sm:$0xff] %vm374_vm0, %v2469_v16 }
  0x97   : > { %387 = vst.msk [vmem:[#allocation2 + $0x60] sm:$0xff] %vm374_vm0, %v2469_v16  ;;  %388 = vst.msk [vmem:[#allocation2 + $0x68] sm:$0xff] %vm374_vm0, %v2469_v16 }
  0x98   : > { %1902 = vmatmul.mubr.f32.gmra.mrb[4].mxu0 %v441_v53  ;;  %389 = vst.msk [vmem:[#allocation2 + $0x70] sm:$0xff] %vm374_vm0, %v2469_v16  ;;  %390 = vst.msk [vmem:[#allocation2 + $0x78] sm:$0xff] %vm374_vm0, %v2469_v16 }
  0x99   : > { %1903 = vmatprep.mubr.f32.mxu0 %v442_v55 }
  0x9c   : > { %1904 = vmatmul.mubr.f32.gmra.mrb[6].mxu0 %v442_v55 }
  0x9d   : > { %1905 = vmatprep.mubr.f32.mxu0 %v443_v57 }
  0xa0   : > { %1906 = vmatmul.mubr.f32.gmra.mrb[8].mxu0 %v443_v57  ;;  %v668_v57 = vunpack.c.2.s8 %v650_v37 }
  0xa1   : > { %1907 = vmatprep.mubr.f32.mxu0 %v444_v59 }
  0xa2   : > { %vm700_vm13 = vcmp.eq.s32.totalorder %v668_v57, 0 }
  0xa4   : > { %1908 = vmatmul.mubr.f32.gmra.mrb[10].mxu0 %v444_v59  ;;  %v669_v59 = vunpack.c.2.s8 %v651_v39 }
  0xa5   : > { %1909 = vmatprep.mubr.f32.mxu0 %v445_v61 }
  0xa6   : > { %vm701_vm14 = vcmp.eq.s32.totalorder %v669_v59, 0 }
  0xa8   : > { %1910 = vmatmul.mubr.f32.gmra.mrb[12].mxu0 %v445_v61  ;;  %v2470_v61 = vmov 0  }
  0xa9   : > { %1911 = vmatprep.mubr.f32.mxu0 %v446_v63  ;;  %2182 = vset.pattern.permute.xlu0 %v2470_v61 }
  0xaa   : > { %2183 = vset.pattern.permute.xlu1 %v2470_v61 }
  0xac   : > { %1912 = vmatmul.mubr.f32.gmra.mrb[14].mxu0 %v446_v63 }
  0xad   : > { %1913 = vmatprep.mubr.f32.mxu0 %v447_v1 }
  0xb0   : > { %1914 = vmatmul.mubr.f32.gmra.mrb[16].mxu0 %v447_v1  ;;  %v670_v1 = vunpack.c.3.s8 %v650_v37  ;;  %v678_v37 = vunpack.c.3.s8 %v2786_v4 }
  0xb1   : > { %1915 = vmatprep.mubr.f32.mxu0 %v448_v3 }
  0xb2   : > { %vm702_vm15 = vcmp.eq.s32.totalorder %v670_v1, 0 }
  0xb4   : > { %1916 = vmatmul.mubr.f32.gmra.mrb[18].mxu0 %v448_v3  ;;  %v671_v3 = vunpack.c.3.s8 %v651_v39  ;;  %v679_v39 = vunpack.c.3.s8 %v2789_v6 }
  0xb5   : > { %1917 = vmatprep.mubr.f32.mxu0 %v449_v5 }
  0xb8   : > { %1918 = vmatmul.mubr.f32.gmra.mrb[20].mxu0 %v449_v5 }
  0xb9   : > { %1919 = vmatprep.mubr.f32.mxu0 %v450_v7 }
  0xbc   : > { %1920 = vmatmul.mubr.f32.gmra.mrb[22].mxu0 %v450_v7 }
  0xbd   : > { %1921 = vmatprep.mubr.f32.mxu0 %v451_v9 }
  0xc0   : > { %1922 = vmatmul.mubr.f32.gmra.mrb[24].mxu0 %v451_v9 }
  0xc1   : > { %1923 = vmatprep.mubr.f32.mxu0 %v452_v11 }
  0xc4   : > { %1924 = vmatmul.mubr.f32.gmra.mrb[26].mxu0 %v452_v11 }
  0xc5   : > { %1925 = vmatprep.mubr.f32.mxu0 %v453_v13 }
  0xc8   : > { %1926 = vmatmul.mubr.f32.gmra.mrb[28].mxu0 %v453_v13  ;;  %v673_v13 = vunpack.c.0.s8 %v2789_v6 }
  0xc9   : > { %1927 = vmatprep.mubr.f32.mxu0 %v454_v15 }
  0xcc   : > { %1928 = vmatmul.mubr.f32.gmra.mrb[30].mxu0 %v454_v15 }
 0x163   : > { %v553_v23 = vpop.f32.mrb[0].mxu0 }
 0x164   : > { %v2747_v24 = vsel %vm688_vm1, -1e+30, %v553_v23  ;;  %v555_v25 = vpop.f32.mrb[1].mxu0  ;;  %vm2798_vm1 = vcmp.eq.s32.totalorder %v671_v3, 0 }
 0x165   : > { %v2749_v26 = vsel %vm689_vm2, -1e+30, %v555_v25  ;;  %vm704_vm2 = vcmp.eq.s32.totalorder %v672_v10, 0 }
 0x166   : > { %v768_v28 = vmax.f32 %v2747_v24, %v2749_v26 }
 0x167   : > { %v559_v30 = vpop.f32.mrb[2].mxu0 }
 0x168   : > { %v2753_v31 = vsel %vm690_vm3, -1e+30, %v559_v30  ;;  %769 = vmax.xlane.f32.xlu0 %v768_v28  ;;  %v561_v32 = vpop.f32.mrb[3].mxu0  ;;  %vm705_vm3 = vcmp.eq.s32.totalorder %v673_v13, 0  ;;  %v676_v28 = vunpack.c.2.s8 %v2786_v4  ;;  %v677_v30 = vunpack.c.2.s8 %v2789_v6 }
 0x169   : > { %v2755_v33 = vsel %vm691_vm4, -1e+30, %v561_v32  ;;  %vm706_vm4 = vcmp.eq.s32.totalorder %v674_v19, 0 }
 0x16a   : > { %v771_v35 = vmax.f32 %v2753_v31, %v2755_v33 }
 0x16b   : > { %v565_v38 = vpop.f32.mrb[4].mxu0 }
 0x16c   : > { %v2761_v40 = vsel %vm692_vm5, -1e+30, %v565_v38  ;;  %772 = vmax.xlane.f32.xlu0 %v771_v35  ;;  %v567_v41 = vpop.f32.mrb[5].mxu0  ;;  %vm707_vm5 = vcmp.eq.s32.totalorder %v675_v21, 0 }
 0x16d   : > { %v2763_v42 = vsel %vm693_vm6, -1e+30, %v567_v41  ;;  %vm708_vm6 = vcmp.eq.s32.totalorder %v676_v28, 0  ;;  %v654_v41 = vld [vmem:[%s2743_s27 + $0x30] sm:$0xff] }
 0x16e   : > { %v774_v44 = vmax.f32 %v2761_v40, %v2763_v42  ;;  %v680_v50 = vunpack.c.0.s8 %v654_v41  ;;  %v682_v59 = vunpack.c.1.s8 %v654_v41  ;;  %v684_v4 = vunpack.c.2.s8 %v654_v41 }
 0x16f   : > { %v571_v46 = vpop.f32.mrb[6].mxu0  ;;  %v686_v13 = vunpack.c.3.s8 %v654_v41  ;;  %v1282_v41 = vld [vmem:[%s2647_s9 + $0x8] sm:$0xff] }
 0x170   : > { %v2767_v47 = vsel %vm694_vm7, -1e+30, %v571_v46  ;;  %775 = vmax.xlane.f32.xlu1 %v774_v44  ;;  %v573_v48 = vpop.f32.mrb[7].mxu0  ;;  %vm709_vm7 = vcmp.eq.s32.totalorder %v677_v30, 0  ;;  %v655_v44 = vld [vmem:[%s2743_s27 + $0x38] sm:$0xff]  ;;  %s2346_s27 = sshll.u32 %s2472_s26, 4  ;;  %s2347_s27 = int_to_ptr.vmem [resolvable:$false] %s2346_s27 }
 0x171   : > { %v2769_v49 = vsel %vm695_vm8, -1e+30, %v573_v48  ;;  %vm710_vm8 = vcmp.eq.s32.totalorder %v678_v37, 0  ;;  %v681_v52 = vunpack.c.0.s8 %v655_v44  ;;  %v683_v61 = vunpack.c.1.s8 %v655_v44  ;;  %v1298_v37 = vld [vmem:[%s2647_s9 + $0x88] sm:$0xff] }
 0x172   : > { %v777_v51 = vmax.f32 %v2767_v47, %v2769_v49  ;;  %v685_v6 = vunpack.c.2.s8 %v655_v44 }
 0x173   : > { %v577_v53 = vpop.f32.mrb[8].mxu0 }
 0x174   : > { %v2773_v54 = vsel %vm696_vm9, -1e+30, %v577_v53  ;;  %778 = vmax.xlane.f32.xlu1 %v777_v51  ;;  %v579_v55 = vpop.f32.mrb[9].mxu0  ;;  %vm711_vm9 = vcmp.eq.s32.totalorder %v679_v39, 0 }
 0x175   : > { %v2775_v56 = vsel %vm697_vm10, -1e+30, %v579_v55  ;;  %vm712_vm10 = vcmp.eq.s32.totalorder %v680_v50, 0 }
 0x176   : > { %v780_v58 = vmax.f32 %v2773_v54, %v2775_v56 }
 0x177   : > { %v583_v60 = vpop.f32.mrb[10].mxu0 }
 0x178   : > { %v2779_v62 = vsel %vm698_vm11, -1e+30, %v583_v60  ;;  %781 = vmax.xlane.f32.xlu0 %v780_v58  ;;  %v585_v63 = vpop.f32.mrb[11].mxu0  ;;  %vm713_vm11 = vcmp.eq.s32.totalorder %v681_v52, 0  ;;  %v1284_v52 = vld [vmem:[%s2647_s9 + $0x18] sm:$0xff] }
 0x179   : > { %v2781_v0 = vsel %vm699_vm12, -1e+30, %v585_v63  ;;  %vm714_vm12 = vcmp.eq.s32.totalorder %v682_v59, 0 }
 0x17a   : > { %v783_v2 = vmax.f32 %v2779_v62, %v2781_v0 }
 0x17b   : > { %v589_v5 = vpop.f32.mrb[12].mxu0 }
 0x17c   : > { %v2791_v7 = vsel %vm700_vm13, -1e+30, %v589_v5  ;;  %784 = vmax.xlane.f32.xlu1 %v783_v2  ;;  %v591_v8 = vpop.f32.mrb[13].mxu0  ;;  %vm715_vm13 = vcmp.eq.s32.totalorder %v683_v61, 0  ;;  %v1285_v61 = vld [vmem:[%s2647_s9 + $0x20] sm:$0xff] }
 0x17d   : > { %v2793_v9 = vsel %vm701_vm14, -1e+30, %v591_v8  ;;  %vm716_vm14 = vcmp.eq.s32.totalorder %v684_v4, 0  ;;  %v1304_v4 = vld [vmem:[%s2647_s9 + $0xb8] sm:$0xff] }
 0x17e   : > { %v786_v11 = vmax.f32 %v2791_v7, %v2793_v9 }
 0x17f   : > { %v595_v14 = vpop.f32.mrb[14].mxu0 }
 0x180   : > { %v2803_v15 = vsel %vm702_vm15, -1e+30, %v595_v14  ;;  %787 = vmax.xlane.f32.xlu0 %v786_v11  ;;  %v597_v16 = vpop.f32.mrb[15].mxu0  ;;  %vm717_vm15 = vcmp.eq.s32.totalorder %v685_v6, 0 }
 0x181   : > { %v2823_v18 = vsel %vm2798_vm1, -1e+30, %v597_v16  ;;  %v687_v16 = vunpack.c.3.s8 %v655_v44  ;;  %vm718_vm1 = vcmp.eq.s32.totalorder %v686_v13, 0  ;;  %v1300_v44 = vld [vmem:[%s2647_s9 + $0x98] sm:$0xff] }
 0x182   : > { %v789_v20 = vmax.f32 %v2803_v15, %v2823_v18 }
 0x183   : > { %v601_v22 = vpop.f32.mrb[16].mxu0 }
 0x184   : > { %v2829_v23 = vsel %vm704_vm2, -1e+30, %v601_v22  ;;  %790 = vmax.xlane.f32.xlu1 %v789_v20  ;;  %v603_v25 = vpop.f32.mrb[17].mxu0  ;;  %vm719_vm2 = vcmp.eq.s32.totalorder %v687_v16, 0 }
 0x185   : > { %v2831_v27 = vsel %vm705_vm3, -1e+30, %v603_v25 }
 0x186   : > { %v792_v29 = vmax.f32 %v2829_v23, %v2831_v27 }
 0x187   : > { %v607_v32 = vpop.f32.mrb[18].mxu0 }
 0x188   : > { %v2837_v34 = vsel %vm706_vm4, -1e+30, %v607_v32  ;;  %793 = vmax.xlane.f32.xlu0 %v792_v29  ;;  %v609_v35 = vpop.f32.mrb[19].mxu0 }
 0x189   : > { %v2839_v36 = vsel %vm707_vm5, -1e+30, %v609_v35  ;;  %v1297_v35 = vld [vmem:[%s2647_s9 + $0x80] sm:$0xff] }
 0x18a   : > { %v795_v38 = vmax.f32 %v2837_v34, %v2839_v36  ;;  %v2041_v39 = vpack.c.bf16 %v1298_v37, %v1297_v35  ;;  %v1290_v35 = vld [vmem:[%s2647_s9 + $0x48] sm:$0xff] }
 0x18b   : > { %v613_v43 = vpop.f32.mrb[20].mxu0 }
 0x18c   : > { %v2847_v45 = vsel %vm708_vm6, -1e+30, %v613_v43  ;;  %796 = vmax.xlane.f32.xlu1 %v795_v38  ;;  %v615_v46 = vpop.f32.mrb[21].mxu0  ;;  %v1281_v38 = vld [vmem:[%s2647_s9] sm:$0xff]  ;;  %v1299_v43 = vld [vmem:[%s2647_s9 + $0x90] sm:$0xff]  ;;  %2042 = vmatprep.subr.bf16.mxu1 %v2041_v39 }
 0x18d   : > { %v2849_v48 = vsel %vm709_vm7, -1e+30, %v615_v46  ;;  %v2043_v46 = vpack.c.bf16 %v1282_v41, %v1281_v38  ;;  %v2045_v50 = vpack.c.bf16 %v1300_v44, %v1299_v43  ;;  %v1307_v43 = vld [vmem:[%s2647_s9 + $0xd0] sm:$0xff]  ;;  %v1308_v44 = vld [vmem:[%s2647_s9 + $0xd8] sm:$0xff] }
 0x18e   : > { %v798_v51 = vmax.f32 %v2847_v45, %v2849_v48 }
 0x18f   : > { %v619_v53 = vpop.f32.mrb[22].mxu0  ;;  %2044 = vmatpush3.bf16.msra.mxu1 %v2043_v46  ;;  %v2920_v46 = vld [vmem:[#allocation2 + $0x10] sm:$0xff] }
 0x190   : > { %v2853_v55 = vsel %vm710_vm8, -1e+30, %v619_v53  ;;  %799 = vmax.xlane.f32.xlu0 %v798_v51  ;;  %v621_v57 = vpop.f32.mrb[23].mxu0  ;;  %v1283_v51 = vld [vmem:[%s2647_s9 + $0x10] sm:$0xff]  ;;  %v1301_v53 = vld [vmem:[%s2647_s9 + $0xa0] sm:$0xff]  ;;  %2046 = vmatprep.subr.bf16.mxu1 %v2045_v50  ;;  %v2061_v50 = vpack.c.bf16 %v1308_v44, %v1307_v43 }
 0x191   : > { %v2855_v58 = vsel %vm711_vm9, -1e+30, %v621_v57  ;;  %v1302_v57 = vld [vmem:[%s2647_s9 + $0xa8] sm:$0xff]  ;;  %v2047_v59 = vpack.c.bf16 %v1284_v52, %v1283_v51  ;;  %v1291_v51 = vld [vmem:[%s2647_s9 + $0x50] sm:$0xff]  ;;  %v1292_v52 = vld [vmem:[%s2647_s9 + $0x58] sm:$0xff] }
 0x192   : > { %v801_v60 = vmax.f32 %v2853_v55, %v2855_v58 }
 0x193   : > { %v625_v63 = vpop.f32.mrb[24].mxu0  ;;  %2048 = vmatpush3.bf16.msra.mxu1 %v2047_v59 }
 0x194   : > { %v2859_v1 = vsel %vm712_vm10, -1e+30, %v625_v63  ;;  %802 = vmax.xlane.f32.xlu1 %v801_v60  ;;  %v627_v2 = vpop.f32.mrb[25].mxu0  ;;  %v2049_v60 = vpack.c.bf16 %v1302_v57, %v1301_v53  ;;  %v1286_v63 = vld [vmem:[%s2647_s9 + $0x28] sm:$0xff]  ;;  %v2063_v57 = vpack.c.bf16 %v1292_v52, %v1291_v51  ;;  %v3030_v52 = vld [vmem:[#allocation2 + $0x60] sm:$0xff]  ;;  %v3050_v53 = vld [vmem:[#allocation2 + $0x70] sm:$0xff] }
 0x195   : > { %v2861_v3 = vsel %vm713_vm11, -1e+30, %v627_v2  ;;  %v1303_v2 = vld [vmem:[%s2647_s9 + $0xb0] sm:$0xff]  ;;  %v2960_v51 = vld [vmem:[#allocation2 + $0x28] sm:$0xff]  ;;  %3405 = vst [vmem:[#allocation18_spill] sm:$0xff] %v3030_v52  ;;  %3409 = vst [vmem:[#allocation22_spill] sm:$0xff] %v3050_v53 }
 0x196   : > { %v804_v5 = vmax.f32 %v2859_v1, %v2861_v3  ;;  %2050 = vmatprep.subr.bf16.mxu1 %v2049_v60  ;;  %v2053_v6 = vpack.c.bf16 %v1304_v4, %v1303_v2  ;;  %v2934_v2 = vld [vmem:[#allocation2 + $0x18] sm:$0xff] }
 0x197   : > { %v631_v8 = vpop.f32.mrb[26].mxu0 }
 0x198   : > { %v2865_v10 = vsel %vm714_vm12, -1e+30, %v631_v8  ;;  %805 = vmax.xlane.f32.xlu0 %v804_v5  ;;  %v633_v11 = vpop.f32.mrb[27].mxu0  ;;  %v2051_v5 = vpack.c.bf16 %v1286_v63, %v1285_v61  ;;  %v1287_v8 = vld [vmem:[%s2647_s9 + $0x30] sm:$0xff]  ;;  %v1309_v61 = vld [vmem:[%s2647_s9 + $0xe0] sm:$0xff]  ;;  %v1310_v63 = vld [vmem:[%s2647_s9 + $0xe8] sm:$0xff] }
 0x199   : > { %v2867_v12 = vsel %vm715_vm13, -1e+30, %v633_v11  ;;  %v1288_v11 = vld [vmem:[%s2647_s9 + $0x38] sm:$0xff]  ;;  %v2065_v4 = vpack.c.bf16 %v1310_v63, %v1309_v61  ;;  %v2970_v61 = vld [vmem:[#allocation2 + $0x30] sm:$0xff] }
 0x19a   : > { %v807_v14 = vmax.f32 %v2865_v10, %v2867_v12  ;;  %2052 = vmatpush3.bf16.msra.mxu1 %v2051_v5  ;;  %v2055_v13 = vpack.c.bf16 %v1288_v11, %v1287_v8  ;;  %v1293_v5 = vld [vmem:[%s2647_s9 + $0x60] sm:$0xff]  ;;  %v3040_v8 = vld [vmem:[#allocation2 + $0x68] sm:$0xff] }
 0x19b   : > { %v637_v17 = vpop.f32.mrb[28].mxu0  ;;  %2054 = vmatprep.subr.bf16.mxu1 %v2053_v6  ;;  %v1294_v6 = vld [vmem:[%s2647_s9 + $0x68] sm:$0xff]  ;;  %3407 = vst [vmem:[#allocation20_spill] sm:$0xff] %v3040_v8 }
 0x19c   : > { %v2871_v19 = vsel %vm716_vm14, -1e+30, %v637_v17  ;;  %808 = vmax.xlane.f32.xlu1 %v807_v14  ;;  %v639_v20 = vpop.f32.mrb[29].mxu0  ;;  %v2899_v14 = vld [vmem:[#allocation2] sm:$0xff]  ;;  %v2067_v11 = vpack.c.bf16 %v1294_v6, %v1293_v5  ;;  %v2980_v6 = vld [vmem:[#allocation2 + $0x38] sm:$0xff] }
 0x19d   : > { %v2873_v21 = vsel %vm717_vm15, -1e+30, %v639_v20  ;;  %v1305_v20 = vld [vmem:[%s2647_s9 + $0xc0] sm:$0xff] }
 0x19e   : > { %v810_v22 = vmax.f32 %v2871_v19, %v2873_v21  ;;  %2056 = vmatpush3.bf16.msra.mxu1 %v2055_v13 }
 0x19f   : > { %v643_v25 = vpop.f32.mrb[30].mxu0 }
 0x1a0   : > { %v2877_v28 = vsel %vm718_vm1, -1e+30, %v643_v25  ;;  %811 = vmax.xlane.f32.xlu0 %v810_v22  ;;  %v645_v29 = vpop.f32.mrb[31].mxu0  ;;  %v1306_v22 = vld [vmem:[%s2647_s9 + $0xc8] sm:$0xff] }
 0x1a1   : > { %v2879_v30 = vsel %vm719_vm2, -1e+30, %v645_v29  ;;  %v2906_v25 = vld [vmem:[#allocation2 + $0x8] sm:$0xff]  ;;  %v2057_v29 = vpack.c.bf16 %v1306_v22, %v1305_v20  ;;  %v1311_v20 = vld [vmem:[%s2647_s9 + $0xf0] sm:$0xff]  ;;  %v1312_v22 = vld [vmem:[%s2647_s9 + $0xf8] sm:$0xff] }
 0x1a2   : > { %v813_v32 = vmax.f32 %v2877_v28, %v2879_v30 }
 0x1a3   : > { %2058 = vmatprep.subr.bf16.mxu1 %v2057_v29  ;;  %v2948_v29 = vld [vmem:[#allocation2 + $0x20] sm:$0xff] }
 0x1a4   : > { %814 = vmax.xlane.f32.xlu1 %v813_v32  ;;  %v1289_v32 = vld [vmem:[%s2647_s9 + $0x40] sm:$0xff] }
 0x1a5   : > { %v2059_v38 = vpack.c.bf16 %v1290_v35, %v1289_v32  ;;  %v2069_v32 = vpack.c.bf16 %v1312_v22, %v1311_v20  ;;  %v1295_v35 = vld [vmem:[%s2647_s9 + $0x70] sm:$0xff]  ;;  %v2990_v22 = vld [vmem:[#allocation2 + $0x40] sm:$0xff] }
 0x1a7   : > { %2060 = vmatpush3.bf16.msra.mxu1 %v2059_v38  ;;  %v1296_v38 = vld [vmem:[%s2647_s9 + $0x78] sm:$0xff]  ;;  %s1847_s9 = sshll.u32 %s329_s21, 7 }
 0x1a8   : > { %2062 = vmatprep.subr.bf16.mxu1 %v2061_v50  ;;  %v2071_v43 = vpack.c.bf16 %v1296_v38, %v1295_v35  ;;  %s3259_s29 = scalar_lea.vmem [#allocation8], %s1847_s9  ;;  %s2348_s9 = scalar_lea.vmem %s2347_s27, 4096 }
 0x1a9   : > { %s1685_s22 = sshll.u32 %s3259_s29, 4  ;;  %s3303_s22 = int_to_ptr.vmem [resolvable:$true] %s1685_s22 }
 0x1aa   : > { %s2342_s18 = scalar_lea.vmem %s3303_s22, 2048  ;;  %p2349_p9 = scmp.lt.s32.totalorder %s3303_s22, %s2347_s27 }
 0x1ab   : > { %2064 = vmatpush3.bf16.msra.mxu1 %v2063_v57  ;;  %p2343_p4 = scmp.ne.s32.totalorder %s3303_s22, %s2342_s18  ;;  %p2350_p3 = scmp.lt.s32.totalorder %s2348_s9, %s2342_s18 }
 0x1ac   : > { %2066 = vmatprep.subr.bf16.mxu1 %v2065_v4 }
 0x1ad   : > { %p2344_p1 = pnand %p2343_p4, %p3442_p0  ;;  %p2351_p11 = por %p2350_p3, %p2349_p9 }
 0x1af   : > { %2068 = vmatpush3.bf16.msra.mxu1 %v2067_v11  ;;  %v3020_v11 = vld [vmem:[#allocation2 + $0x58] sm:$0xff]  ;;  %p2345_p6 = pneg %p2344_p1 }
 0x1b0   : > { %2070 = vmatprep.subr.bf16.mxu1 %v2069_v32  ;;  %3403 = vst [vmem:[#allocation16_spill] sm:$0xff] %v3020_v11 }
 0x1b1   : > { %p2352_p13 = pnand %p2351_p11, %p2345_p6 }
 0x1b3   : > { %2072 = vmatpush3.bf16.msra.mxu1 %v2071_v43  ;;  %v3000_v43 = vld [vmem:[#allocation2 + $0x48] sm:$0xff] }
 0x1f5   : > { %v770_v16 = vpop.xlane.xlu0 %769 }
 0x1f6   : > { %v2902_v17 = vmax.f32 %v2899_v14, %v770_v16 }
 0x1f8   : > { %1490 = vst.msk [vmem:[#allocation2] sm:$0xff] %vm374_vm0, %v2902_v17  ;;  %882 = vperm.xlu0 %2182, %v2902_v17  }
 0x1f9   : > { %v773_v39 = vpop.xlane.xlu0 %772 }
 0x1fa   : > { %v2916_v41 = vmax.f32 %v2906_v25, %v773_v39 }
 0x1fc   : > { %1491 = vst.msk [vmem:[#allocation2 + $0x8] sm:$0xff] %vm374_vm0, %v2916_v41  ;;  %887 = vperm.xlu1 %2183, %v2916_v41  }
 0x1fd   : > { %v776_v59 = vpop.xlane.xlu1 %775 }
 0x1fe   : > { %v2930_v60 = vmax.f32 %v2920_v46, %v776_v59 }
 0x200   : > { %1492 = vst.msk [vmem:[#allocation2 + $0x10] sm:$0xff] %vm374_vm0, %v2930_v60  ;;  %892 = vperm.xlu1 %2183, %v2930_v60  }
 0x201   : > { %v779_v13 = vpop.xlane.xlu1 %778 }
 0x202   : > { %v2944_v16 = vmax.f32 %v2934_v2, %v779_v13 }
 0x204   : > { %1493 = vst.msk [vmem:[#allocation2 + $0x18] sm:$0xff] %vm374_vm0, %v2944_v16  ;;  %897 = vperm.xlu1 %2183, %v2944_v16  }
 0x205   : > { %v782_v44 = vpop.xlane.xlu0 %781 }
 0x206   : > { %v2958_v50 = vmax.f32 %v2948_v29, %v782_v44 }
 0x208   : > { %1494 = vst.msk [vmem:[#allocation2 + $0x20] sm:$0xff] %vm374_vm0, %v2958_v50  ;;  %902 = vperm.xlu1 %2183, %v2958_v50  }
 0x209   : > { %v785_v57 = vpop.xlane.xlu1 %784 }
 0x20a   : > { %v2968_v59 = vmax.f32 %v2960_v51, %v785_v57 }
 0x20c   : > { %1495 = vst.msk [vmem:[#allocation2 + $0x28] sm:$0xff] %vm374_vm0, %v2968_v59  ;;  %907 = vperm.xlu1 %2183, %v2968_v59  }
 0x20d   : > { %v788_v4 = vpop.xlane.xlu0 %787 }
 0x20e   : > { %v2978_v5 = vmax.f32 %v2970_v61, %v788_v4 }
 0x210   : > { %1496 = vst.msk [vmem:[#allocation2 + $0x30] sm:$0xff] %vm374_vm0, %v2978_v5  ;;  %912 = vperm.xlu1 %2183, %v2978_v5  }
 0x211   : > { %v791_v13 = vpop.xlane.xlu1 %790 }
 0x212   : > { %v2988_v20 = vmax.f32 %v2980_v6, %v791_v13  ;;  %v3010_v13 = vld [vmem:[#allocation2 + $0x50] sm:$0xff] }
 0x213   : > { %3401 = vst [vmem:[#allocation14_spill] sm:$0xff] %v3010_v13 }
 0x214   : > { %1497 = vst.msk [vmem:[#allocation2 + $0x38] sm:$0xff] %vm374_vm0, %v2988_v20  ;;  %917 = vperm.xlu1 %2183, %v2988_v20  }
 0x215   : > { %v794_v35 = vpop.xlane.xlu0 %793 }
 0x216   : > { %v2998_v38 = vmax.f32 %v2990_v22, %v794_v35 }
 0x218   : > { %1498 = vst.msk [vmem:[#allocation2 + $0x40] sm:$0xff] %vm374_vm0, %v2998_v38  ;;  %922 = vperm.xlu1 %2183, %v2998_v38  }
 0x219   : > { %v797_v57 = vpop.xlane.xlu1 %796 }
 0x21a   : > { %v3008_v4 = vmax.f32 %v3000_v43, %v797_v57 }
 0x21c   : > { %3400 = vst [vmem:[#allocation13_spill] sm:$0xff] %v3008_v4  ;;  %1499 = vst.msk [vmem:[#allocation2 + $0x48] sm:$0xff] %vm374_vm0, %v3008_v4  ;;  %927 = vperm.xlu0 %2182, %v3008_v4  }
 0x21d   : > { %v800_v44 = vpop.xlane.xlu0 %799 }
 0x21e   : > { %v3018_v32 = vmax.f32 %v3010_v13, %v800_v44 }
 0x220   : > { %3402 = vst [vmem:[#allocation15_spill] sm:$0xff] %v3018_v32  ;;  %1500 = vst.msk [vmem:[#allocation2 + $0x50] sm:$0xff] %vm374_vm0, %v3018_v32  ;;  %932 = vperm.xlu1 %2183, %v3018_v32  }
 0x221   : > { %v803_v35 = vpop.xlane.xlu1 %802 }
 0x222   : > { %v3028_v63 = vmax.f32 %v3020_v11, %v803_v35 }
 0x224   : > { %3404 = vst [vmem:[#allocation17_spill] sm:$0xff] %v3028_v63  ;;  %1501 = vst.msk [vmem:[#allocation2 + $0x58] sm:$0xff] %vm374_vm0, %v3028_v63  ;;  %937 = vperm.xlu0 %2182, %v3028_v63   ;;  %v3060_v63 = vld [vmem:[#allocation2 + $0x78] sm:$0xff] }
 0x225   : > { %v806_v57 = vpop.xlane.xlu0 %805  ;;  %3411 = vst [vmem:[#allocation24_spill] sm:$0xff] %v3060_v63 }
 0x226   : > { %v3038_v39 = vmax.f32 %v3030_v52, %v806_v57 }
 0x228   : > { %3406 = vst [vmem:[#allocation19_spill] sm:$0xff] %v3038_v39  ;;  %1502 = vst.msk [vmem:[#allocation2 + $0x60] sm:$0xff] %vm374_vm0, %v3038_v39  ;;  %942 = vperm.xlu1 %2183, %v3038_v39  }
 0x229   : > { %v809_v44 = vpop.xlane.xlu1 %808 }
 0x22a   : > { %v3048_v37 = vmax.f32 %v3040_v8, %v809_v44 }
 0x22c   : > { %3408 = vst [vmem:[#allocation21_spill] sm:$0xff] %v3048_v37  ;;  %1503 = vst.msk [vmem:[#allocation2 + $0x68] sm:$0xff] %vm374_vm0, %v3048_v37  ;;  %947 = vperm.xlu0 %2182, %v3048_v37  }
 0x22d   : > { %v812_v35 = vpop.xlane.xlu0 %811 }
 0x22e   : > { %v3058_v52 = vmax.f32 %v3050_v53, %v812_v35 }
 0x230   : > { %3410 = vst [vmem:[#allocation23_spill] sm:$0xff] %v3058_v52  ;;  %1504 = vst.msk [vmem:[#allocation2 + $0x70] sm:$0xff] %vm374_vm0, %v3058_v52  ;;  %952 = vperm.xlu1 %2183, %v3058_v52  }
 0x231   : > { %v815_v57 = vpop.xlane.xlu1 %814 }
 0x232   : > { %v3068_v8 = vmax.f32 %v3060_v63, %v815_v57 }
 0x234   : > { %3412 = vst [vmem:[#allocation25_spill] sm:$0xff] %v3068_v8  ;;  %1505 = vst.msk [vmem:[#allocation2 + $0x78] sm:$0xff] %vm374_vm0, %v3068_v8  ;;  %957 = vperm.xlu0 %2182, %v3068_v8  }
 0x277   : > { %v883_v35 = vpop.permute.xlu0 %882 }
 0x278   : > { %v960_v44 = vsub.f32 %v2747_v24, %v883_v35  ;;  %v961_v53 = vsub.f32 %v2749_v26, %v883_v35 }
 0x27a   : > { %v992_v39 = vmul.f32 1.442695, %v960_v44  ;;  %v994_v11 = vmul.f32 1.442695, %v961_v53 }
 0x27b   : > { %v888_v52 = vpop.permute.xlu1 %887 }
 0x27c   : > { %2184 = vpow2.f32 %v992_v39  ;;  %v962_v57 = vsub.f32 %v2753_v31, %v888_v52  ;;  %v963_v32 = vsub.f32 %v2755_v33, %v888_v52 }
 0x27d   : > { %2186 = vpow2.f32 %v994_v11 }
 0x27e   : > { %v996_v37 = vmul.f32 1.442695, %v962_v57  ;;  %v998_v63 = vmul.f32 1.442695, %v963_v32 }
 0x27f   : > { %v893_v13 = vpop.permute.xlu1 %892 }
 0x280   : > { %2188 = vpow2.f32 %v996_v37  ;;  %v964_v8 = vsub.f32 %v2761_v40, %v893_v13  ;;  %v965_v4 = vsub.f32 %v2763_v42, %v893_v13 }
 0x281   : > { %2190 = vpow2.f32 %v998_v63 }
 0x282   : > { %v1000_v24 = vmul.f32 1.442695, %v964_v8  ;;  %v1002_v26 = vmul.f32 1.442695, %v965_v4 }
 0x283   : > { %v898_v44 = vpop.permute.xlu1 %897 }
 0x284   : > { %2192 = vpow2.f32 %v1000_v24  ;;  %v966_v53 = vsub.f32 %v2767_v47, %v898_v44  ;;  %v967_v31 = vsub.f32 %v2769_v49, %v898_v44 }
 0x285   : > { %2194 = vpow2.f32 %v1002_v26 }
 0x286   : > { %v2185_v33 = vpop.eup %2184  ;;  %v1004_v39 = vmul.f32 1.442695, %v966_v53  ;;  %v1006_v52 = vmul.f32 1.442695, %v967_v31 }
 0x287   : > { %v2187_v11 = vpop.eup %2186  ;;  %v903_v32 = vpop.permute.xlu1 %902 }
 0x288   : > { %2196 = vpow2.f32 %v1004_v39  ;;  %v968_v40 = vsub.f32 %v2773_v54, %v903_v32  ;;  %v969_v42 = vsub.f32 %v2775_v56, %v903_v32  ;;  %1377 = vmatprep.mubr.f32.mxu1 %v2187_v11  ;;  %v1088_v37 = vadd.f32 %v2187_v11, %v2185_v33 }
 0x289   : > { %2198 = vpow2.f32 %v1006_v52  ;;  %1378 = vmatmul.mubr.f32.vlgmr.msra.gmra.mrb[0].mxu1 %v2185_v33 }
 0x28a   : > { %v2189_v8 = vpop.eup %2188  ;;  %v1008_v63 = vmul.f32 1.442695, %v968_v40  ;;  %v1010_v47 = vmul.f32 1.442695, %v969_v42  ;;  %1089 = vadd.xlane.f32.xlu1 %v1088_v37 }
 0x28b   : > { %v2191_v49 = vpop.eup %2190  ;;  %v908_v4 = vpop.permute.xlu1 %907 }
 0x28c   : > { %2200 = vpow2.f32 %v1008_v63  ;;  %v970_v13 = vsub.f32 %v2779_v62, %v908_v4  ;;  %v971_v35 = vsub.f32 %v2781_v0, %v908_v4  ;;  %1382 = vmatprep.mubr.f32.mxu1 %v2191_v49  ;;  %v1091_v57 = vadd.f32 %v2191_v49, %v2189_v8 }
 0x28d   : > { %2202 = vpow2.f32 %v1010_v47  ;;  %1383 = vmatmul.mubr.f32.gmra.mrb[2].mxu1 %v2189_v8 }
 0x28e   : > { %v2193_v54 = vpop.eup %2192  ;;  %v1012_v56 = vmul.f32 1.442695, %v970_v13  ;;  %v1014_v24 = vmul.f32 1.442695, %v971_v35  ;;  %1092 = vadd.xlane.f32.xlu0 %v1091_v57 }
 0x28f   : > { %v2195_v26 = vpop.eup %2194  ;;  %v913_v44 = vpop.permute.xlu1 %912 }
 0x290   : > { %2204 = vpow2.f32 %v1012_v56  ;;  %v972_v53 = vsub.f32 %v2791_v7, %v913_v44  ;;  %v973_v31 = vsub.f32 %v2793_v9, %v913_v44  ;;  %1387 = vmatprep.mubr.f32.mxu1 %v2195_v26  ;;  %v1094_v33 = vadd.f32 %v2195_v26, %v2193_v54 }
 0x291   : > { %2206 = vpow2.f32 %v1014_v24  ;;  %1388 = vmatmul.mubr.f32.gmra.mrb[4].mxu1 %v2193_v54 }
 0x292   : > { %v2197_v62 = vpop.eup %2196  ;;  %v1016_v0 = vmul.f32 1.442695, %v972_v53  ;;  %v1018_v39 = vmul.f32 1.442695, %v973_v31  ;;  %1095 = vadd.xlane.f32.xlu0 %v1094_v33 }
 0x293   : > { %v2199_v52 = vpop.eup %2198  ;;  %v918_v11 = vpop.permute.xlu1 %917 }
 0x294   : > { %2208 = vpow2.f32 %v1016_v0  ;;  %v974_v32 = vsub.f32 %v2803_v15, %v918_v11  ;;  %v975_v40 = vsub.f32 %v2823_v18, %v918_v11  ;;  %1392 = vmatprep.mubr.f32.mxu1 %v2199_v52  ;;  %v1097_v42 = vadd.f32 %v2199_v52, %v2197_v62 }
 0x295   : > { %2210 = vpow2.f32 %v1018_v39  ;;  %1393 = vmatmul.mubr.f32.gmra.mrb[6].mxu1 %v2197_v62 }
 0x296   : > { %v2201_v7 = vpop.eup %2200  ;;  %v1020_v9 = vmul.f32 1.442695, %v974_v32  ;;  %v1022_v37 = vmul.f32 1.442695, %v975_v40  ;;  %1098 = vadd.xlane.f32.xlu1 %v1097_v42 }
 0x297   : > { %v2203_v8 = vpop.eup %2202  ;;  %v923_v63 = vpop.permute.xlu1 %922 }
 0x298   : > { %2212 = vpow2.f32 %v1020_v9  ;;  %v976_v47 = vsub.f32 %v2829_v23, %v923_v63  ;;  %v977_v49 = vsub.f32 %v2831_v27, %v923_v63  ;;  %1397 = vmatprep.mubr.f32.mxu1 %v2203_v8  ;;  %v1100_v4 = vadd.f32 %v2203_v8, %v2201_v7 }
 0x299   : > { %2214 = vpow2.f32 %v1022_v37  ;;  %1398 = vmatmul.mubr.f32.gmra.mrb[8].mxu1 %v2201_v7 }
 0x29a   : > { %v2205_v15 = vpop.eup %2204  ;;  %v1024_v18 = vmul.f32 1.442695, %v976_v47  ;;  %v1026_v13 = vmul.f32 1.442695, %v977_v49  ;;  %1101 = vadd.xlane.f32.xlu0 %v1100_v4 }
 0x29b   : > { %v2207_v35 = vpop.eup %2206  ;;  %v928_v57 = vpop.permute.xlu0 %927 }
 0x29c   : > { %2216 = vpow2.f32 %v1024_v18  ;;  %1402 = vmatprep.mubr.f32.mxu1 %v2207_v35  ;;  %v978_v54 = vsub.f32 %v2837_v34, %v928_v57  ;;  %v979_v56 = vsub.f32 %v2839_v36, %v928_v57  ;;  %v1103_v24 = vadd.f32 %v2207_v35, %v2205_v15 }
 0x29d   : > { %2218 = vpow2.f32 %v1026_v13  ;;  %1403 = vmatmul.mubr.f32.gmra.mrb[10].mxu1 %v2205_v15 }
 0x29e   : > { %v2209_v23 = vpop.eup %2208  ;;  %v1028_v27 = vmul.f32 1.442695, %v978_v54  ;;  %v1030_v26 = vmul.f32 1.442695, %v979_v56  ;;  %1104 = vadd.xlane.f32.xlu1 %v1103_v24 }
 0x29f   : > { %v2211_v44 = vpop.eup %2210  ;;  %v933_v53 = vpop.permute.xlu1 %932 }
 0x2a0   : > { %2220 = vpow2.f32 %v1028_v27  ;;  %v980_v31 = vsub.f32 %v2847_v45, %v933_v53  ;;  %v981_v33 = vsub.f32 %v2849_v48, %v933_v53  ;;  %1407 = vmatprep.mubr.f32.mxu1 %v2211_v44  ;;  %v1106_v62 = vadd.f32 %v2211_v44, %v2209_v23 }
 0x2a1   : > { %2222 = vpow2.f32 %v1030_v26  ;;  %1408 = vmatmul.mubr.f32.gmra.mrb[12].mxu1 %v2209_v23 }
 0x2a2   : > { %v2213_v34 = vpop.eup %2212  ;;  %v1032_v36 = vmul.f32 1.442695, %v980_v31  ;;  %v1034_v0 = vmul.f32 1.442695, %v981_v33  ;;  %1107 = vadd.xlane.f32.xlu0 %v1106_v62 }
 0x2a3   : > { %v2215_v39 = vpop.eup %2214  ;;  %v938_v52 = vpop.permute.xlu0 %937 }
 0x2a4   : > { %2224 = vpow2.f32 %v1032_v36  ;;  %1412 = vmatprep.mubr.f32.mxu1 %v2215_v39  ;;  %v982_v11 = vsub.f32 %v2853_v55, %v938_v52  ;;  %v983_v32 = vsub.f32 %v2855_v58, %v938_v52  ;;  %v1109_v40 = vadd.f32 %v2215_v39, %v2213_v34 }
 0x2a5   : > { %2226 = vpow2.f32 %v1034_v0  ;;  %1413 = vmatmul.mubr.f32.gmra.mrb[14].mxu1 %v2213_v34 }
 0x2a6   : > { %v2217_v45 = vpop.eup %2216  ;;  %v1036_v48 = vmul.f32 1.442695, %v982_v11  ;;  %v1038_v42 = vmul.f32 1.442695, %v983_v32  ;;  %1110 = vadd.xlane.f32.xlu1 %v1109_v40 }
 0x2a7   : > { %v2219_v7 = vpop.eup %2218  ;;  %v943_v9 = vpop.permute.xlu1 %942 }
 0x2a8   : > { %2228 = vpow2.f32 %v1036_v48  ;;  %v984_v37 = vsub.f32 %v2859_v1, %v943_v9  ;;  %v985_v8 = vsub.f32 %v2861_v3, %v943_v9  ;;  %1417 = vmatprep.mubr.f32.mxu1 %v2219_v7  ;;  %v1112_v63 = vadd.f32 %v2219_v7, %v2217_v45 }
 0x2a9   : > { %2230 = vpow2.f32 %v1038_v42  ;;  %1418 = vmatmul.mubr.f32.gmra.mrb[16].mxu1 %v2217_v45  ;;  %v3413_v48 = vsub.f32 %v2906_v25, %v2916_v41  ;;  %v3414_v7 = vsub.f32 %v2899_v14, %v2902_v17  ;;  %v3418_v14 = vsub.f32 %v2960_v51, %v2968_v59  ;;  %v3422_v51 = vld [vmem:[#allocation13_spill] sm:$0xff] }
 0x2aa   : > { %v2221_v55 = vpop.eup %2220  ;;  %v1040_v58 = vmul.f32 1.442695, %v984_v37  ;;  %v1042_v47 = vmul.f32 1.442695, %v985_v8  ;;  %1113 = vadd.xlane.f32.xlu0 %v1112_v63  ;;  %v3415_v37 = vsub.f32 %v2920_v46, %v2930_v60  ;;  %v3416_v63 = vsub.f32 %v2934_v2, %v2944_v16 }
 0x2ab   : > { %v2223_v49 = vpop.eup %2222  ;;  %v948_v4 = vpop.permute.xlu0 %947  ;;  %v850_v42 = vmul.f32 1.442695, %v3413_v48  ;;  %v848_v9 = vmul.f32 1.442695, %v3414_v7  ;;  %v858_v17 = vmul.f32 1.442695, %v3418_v14  ;;  %v3419_v41 = vsub.f32 %v2970_v61, %v2978_v5 }
 0x2ac   : > { %2232 = vpow2.f32 %v1040_v58  ;;  %1422 = vmatprep.mubr.f32.mxu1 %v2223_v49  ;;  %v986_v15 = vsub.f32 %v2865_v10, %v948_v4  ;;  %v987_v18 = vsub.f32 %v2867_v12, %v948_v4  ;;  %v1115_v13 = vadd.f32 %v2223_v49, %v2221_v55  ;;  %v1057_v48 = vld [vmem:[#allocation3 + $0x8] sm:$0xff] }
 0x2ad   : > { %2234 = vpow2.f32 %v1042_v47  ;;  %1423 = vmatmul.mubr.f32.gmra.mrb[18].mxu1 %v2221_v55  ;;  %v852_v8 = vmul.f32 1.442695, %v3415_v37  ;;  %v854_v55 = vmul.f32 1.442695, %v3416_v63  ;;  %v3417_v58 = vsub.f32 %v2948_v29, %v2958_v50  ;;  %v1058_v37 = vld [vmem:[#allocation3 + $0x10] sm:$0xff] }
 0x2ae   : > { %v2225_v1 = vpop.eup %2224  ;;  %v1044_v3 = vmul.f32 1.442695, %v986_v15  ;;  %v1046_v35 = vmul.f32 1.442695, %v987_v18  ;;  %1116 = vadd.xlane.f32.xlu1 %v1115_v13  ;;  %v860_v46 = vmul.f32 1.442695, %v3419_v41  ;;  %v3420_v60 = vsub.f32 %v2980_v6, %v2988_v20 }
 0x2af   : > { %v2227_v57 = vpop.eup %2226  ;;  %v953_v54 = vpop.permute.xlu1 %952  ;;  %v856_v25 = vmul.f32 1.442695, %v3417_v58  ;;  %v3421_v29 = vsub.f32 %v2990_v22, %v2998_v38  ;;  %v3423_v59 = vsub.f32 %v3000_v43, %v3422_v51  ;;  %v3424_v6 = vld [vmem:[#allocation14_spill] sm:$0xff]  ;;  %v3425_v20 = vld [vmem:[#allocation15_spill] sm:$0xff]  ;;  %v3427_v18 = vld [vmem:[#allocation16_spill] sm:$0xff] }
 0x2b0   : > { %2236 = vpow2.f32 %v1044_v3  ;;  %v988_v56 = vsub.f32 %v2871_v19, %v953_v54  ;;  %v989_v24 = vsub.f32 %v2873_v21, %v953_v54  ;;  %1427 = vmatprep.mubr.f32.mxu1 %v2227_v57  ;;  %v1118_v23 = vadd.f32 %v2227_v57, %v2225_v1  ;;  %v3428_v13 = vld [vmem:[#allocation17_spill] sm:$0xff]  ;;  %v3430_v43 = vld [vmem:[#allocation18_spill] sm:$0xff]  ;;  %v1059_v58 = vld [vmem:[#allocation3 + $0x18] sm:$0xff] }
 0x2b1   : > { %2238 = vpow2.f32 %v1046_v35  ;;  %1428 = vmatmul.mubr.f32.gmra.mrb[20].mxu1 %v2225_v1  ;;  %v862_v2 = vmul.f32 1.442695, %v3420_v60  ;;  %v864_v50 = vmul.f32 1.442695, %v3421_v29  ;;  %v866_v61 = vmul.f32 1.442695, %v3423_v59 }
 0x2b2   : > { %v2229_v10 = vpop.eup %2228  ;;  %v1048_v12 = vmul.f32 1.442695, %v988_v56  ;;  %v1050_v27 = vmul.f32 1.442695, %v989_v24  ;;  %1119 = vadd.xlane.f32.xlu0 %v1118_v23  ;;  %v3426_v4 = vsub.f32 %v3424_v6, %v3425_v20  ;;  %v3429_v22 = vsub.f32 %v3427_v18, %v3428_v13  ;;  %v3431_v35 = vld [vmem:[#allocation19_spill] sm:$0xff]  ;;  %v3433_v56 = vld [vmem:[#allocation20_spill] sm:$0xff] }
 0x2b3   : > { %v2231_v26 = vpop.eup %2230  ;;  %v958_v44 = vpop.permute.xlu0 %957  ;;  %v3432_v57 = vsub.f32 %v3430_v43, %v3431_v35  ;;  %v3434_v24 = vld [vmem:[#allocation21_spill] sm:$0xff]  ;;  %v1061_v29 = vld [vmem:[#allocation3 + $0x28] sm:$0xff]  ;;  %v1063_v18 = vld [vmem:[#allocation3 + $0x38] sm:$0xff] }
 0x2b4   : > { %2240 = vpow2.f32 %v1048_v12  ;;  %1432 = vmatprep.mubr.f32.mxu1 %v2231_v26  ;;  %v990_v53 = vsub.f32 %v2877_v28, %v958_v44  ;;  %v991_v31 = vsub.f32 %v2879_v30, %v958_v44  ;;  %v1121_v33 = vadd.f32 %v2231_v26, %v2229_v10  ;;  %v3436_v26 = vld [vmem:[#allocation22_spill] sm:$0xff]  ;;  %v3437_v44 = vld [vmem:[#allocation23_spill] sm:$0xff]  ;;  %v1064_v43 = vld [vmem:[#allocation3 + $0x40] sm:$0xff] }
 0x2b5   : > { %2242 = vpow2.f32 %v1050_v27  ;;  %1433 = vmatmul.mubr.f32.gmra.mrb[22].mxu1 %v2229_v10  ;;  %v868_v15 = vmul.f32 1.442695, %v3426_v4  ;;  %v870_v38 = vmul.f32 1.442695, %v3429_v22  ;;  %v872_v54 = vmul.f32 1.442695, %v3432_v57 }
 0x2b6   : > { %v2233_v19 = vpop.eup %2232  ;;  %v1052_v21 = vmul.f32 1.442695, %v990_v53  ;;  %v1054_v62 = vmul.f32 1.442695, %v991_v31  ;;  %1122 = vadd.xlane.f32.xlu1 %v1121_v33  ;;  %v3435_v23 = vsub.f32 %v3433_v56, %v3434_v24  ;;  %v3438_v53 = vsub.f32 %v3436_v26, %v3437_v44  ;;  %v3439_v33 = vld [vmem:[#allocation24_spill] sm:$0xff] }
 0x2b7   : > { %v2235_v34 = vpop.eup %2234 }
 0x2b8   : > { %2244 = vpow2.f32 %v1052_v21  ;;  %1437 = vmatprep.mubr.f32.mxu1 %v2235_v34  ;;  %v1124_v36 = vadd.f32 %v2235_v34, %v2233_v19  ;;  %v874_v10 = vmul.f32 1.442695, %v3435_v23  ;;  %v876_v31 = vmul.f32 1.442695, %v3438_v53  ;;  %v1065_v23 = vld [vmem:[#allocation3 + $0x48] sm:$0xff]  ;;  %v1066_v53 = vld [vmem:[#allocation3 + $0x50] sm:$0xff] }
 0x2b9   : > { %2246 = vpow2.f32 %v1054_v62  ;;  %1438 = vmatmul.mubr.f32.gmra.mrb[24].mxu1 %v2233_v19  ;;  %v3440_v19 = vld [vmem:[#allocation25_spill] sm:$0xff] }
 0x2ba   : > { %v2237_v0 = vpop.eup %2236  ;;  %1125 = vadd.xlane.f32.xlu0 %v1124_v36  ;;  %2248 = vpow2.f32 %v850_v42  ;;  %v3441_v21 = vsub.f32 %v3439_v33, %v3440_v19 }
 0x2bb   : > { %v2239_v39 = vpop.eup %2238  ;;  %2250 = vpow2.f32 %v848_v9 }
 0x2bc   : > { %1442 = vmatprep.mubr.f32.mxu1 %v2239_v39  ;;  %v1127_v28 = vadd.f32 %v2239_v39, %v2237_v0  ;;  %2252 = vpow2.f32 %v852_v8  ;;  %v878_v62 = vmul.f32 1.442695, %v3441_v21 }
 0x2bd   : > { %1443 = vmatmul.mubr.f32.gmra.mrb[26].mxu1 %v2237_v0  ;;  %2254 = vpow2.f32 %v854_v55 }
 0x2be   : > { %v2241_v30 = vpop.eup %2240  ;;  %1128 = vadd.xlane.f32.xlu1 %v1127_v28  ;;  %2256 = vpow2.f32 %v856_v25 }
 0x2bf   : > { %v2243_v52 = vpop.eup %2242  ;;  %2258 = vpow2.f32 %v858_v17 }
 0x2c0   : > { %1447 = vmatprep.mubr.f32.mxu1 %v2243_v52  ;;  %v1130_v11 = vadd.f32 %v2243_v52, %v2241_v30  ;;  %2260 = vpow2.f32 %v860_v46  ;;  %v1060_v46 = vld [vmem:[#allocation3 + $0x20] sm:$0xff] }
 0x2c1   : > { %1448 = vmatmul.mubr.f32.gmra.mrb[28].mxu1 %v2241_v30  ;;  %2262 = vpow2.f32 %v862_v2 }
 0x2c2   : > { %v2245_v32 = vpop.eup %2244  ;;  %1131 = vadd.xlane.f32.xlu0 %v1130_v11  ;;  %2264 = vpow2.f32 %v864_v50 }
 0x2c3   : > { %v2247_v40 = vpop.eup %2246  ;;  %2266 = vpow2.f32 %v866_v61 }
 0x2c4   : > { %1452 = vmatprep.mubr.f32.mxu1 %v2247_v40  ;;  %v1133_v45 = vadd.f32 %v2247_v40, %v2245_v32  ;;  %v2249_v16 = vpop.eup %2248  ;;  %2268 = vpow2.f32 %v868_v15 }
 0x2c5   : > { %1453 = vmatmul.mubr.f32.gmra.mrb[30].mxu1 %v2245_v32  ;;  %v2251_v47 = vpop.eup %2250  ;;  %2270 = vpow2.f32 %v870_v38  ;;  %v1056_v32 = vld [vmem:[#allocation3] sm:$0xff]  ;;  %v1073_v7 = vmul.f32 %v2249_v16, %v1057_v48 }
 0x2c6   : > { %1134 = vadd.xlane.f32.xlu1 %v1133_v45  ;;  %v2253_v5 = vpop.eup %2252  ;;  %2272 = vpow2.f32 %v872_v54  ;;  %v1072_v40 = vmul.f32 %v2251_v47, %v1056_v32 }
 0x2c7   : > { %v2255_v49 = vpop.eup %2254  ;;  %2274 = vpow2.f32 %v874_v10  ;;  %v1074_v63 = vmul.f32 %v2253_v5, %v1058_v37 }
 0x2c8   : > { %v2257_v1 = vpop.eup %2256  ;;  %2276 = vpow2.f32 %v876_v31  ;;  %v1075_v17 = vmul.f32 %v2255_v49, %v1059_v58 }
 0x2c9   : > { %v3143_v3 = vpop.eup %2258  ;;  %2278 = vpow2.f32 %v878_v62 }
 0x2ca   : > { %v3152_v12 = vpop.eup %2260  ;;  %v1077_v59 = vmul.f32 %v3143_v3, %v1061_v29 }
 0x2cb   : > { %v3154_v27 = vpop.eup %2262 }
 0x2cc   : > { %v3164_v34 = vpop.eup %2264 }
 0x2cd   : > { %v3166_v36 = vpop.eup %2266  ;;  %v1080_v56 = vmul.f32 %v3164_v34, %v1064_v43 }
 0x2ce   : > { %v3170_v0 = vpop.eup %2268 }
 0x2cf   : > { %v3172_v39 = vpop.eup %2270  ;;  %v1082_v21 = vmul.f32 %v3170_v0, %v1066_v53 }
 0x2d0   : > { %v3176_v28 = vpop.eup %2272 }
 0x2d1   : > { %v3178_v30 = vpop.eup %2274 }
 0x2d2   : > { %v3182_v52 = vpop.eup %2276 }
 0x2d3   : > { %v3184_v11 = vpop.eup %2278 }
 0x2d7   : > { %1192 = vperm.xlu1 %2183, %v2249_v16   ;;  %v1076_v16 = vmul.f32 %v2257_v1, %v1060_v46 }
 0x2d8   : > { %1187 = vperm.xlu0 %2182, %v2251_v47  }
 0x2db   : > { %1197 = vperm.xlu1 %2183, %v2253_v5   ;;  %v1062_v5 = vld [vmem:[#allocation3 + $0x30] sm:$0xff] }
 0x2dc   : > { %1202 = vperm.xlu0 %2182, %v2255_v49   ;;  %v1078_v4 = vmul.f32 %v3152_v12, %v1062_v5 }
 0x2df   : > { %1207 = vperm.xlu1 %2183, %v2257_v1   ;;  %v1079_v1 = vmul.f32 %v3154_v27, %v1063_v18 }
 0x2e0   : > { %1212 = vperm.xlu0 %2182, %v3143_v3  }
 0x2e3   : > { %1217 = vperm.xlu1 %2183, %v3152_v12  }
 0x2e4   : > { %1222 = vperm.xlu0 %2182, %v3154_v27   ;;  %v1081_v27 = vmul.f32 %v3166_v36, %v1065_v23 }
 0x2e7   : > { %1227 = vperm.xlu1 %2183, %v3164_v34   ;;  %v1067_v34 = vld [vmem:[#allocation3 + $0x58] sm:$0xff] }
 0x2e8   : > { %1232 = vperm.xlu0 %2182, %v3166_v36   ;;  %v1083_v36 = vmul.f32 %v3172_v39, %v1067_v34 }
 0x2eb   : > { %1237 = vperm.xlu1 %2183, %v3170_v0  }
 0x2ec   : > { %1242 = vperm.xlu0 %2182, %v3172_v39  }
 0x2ef   : > { %1247 = vperm.xlu1 %2183, %v3176_v28  }
 0x2f0   : > { %1252 = vperm.xlu0 %2182, %v3178_v30  }
 0x2f3   : > { %1257 = vperm.xlu1 %2183, %v3182_v52  }
 0x2f4   : > { %1262 = vperm.xlu0 %2182, %v3184_v11  }
 0x317   : > { %v1090_v45 = vpop.xlane.xlu1 %1089 }
 0x318   : > { %v1136_v42 = vadd.f32 %v1090_v45, %v1072_v40 }
 0x31a   : > { %1153 = vst.msk [vmem:[#allocation3] sm:$0xff] %vm374_vm0, %v1136_v42  ;;  %v1068_v42 = vld [vmem:[#allocation3 + $0x60] sm:$0xff] }
 0x31b   : > { %v1093_v9 = vpop.xlane.xlu0 %1092  ;;  %v1084_v0 = vmul.f32 %v3176_v28, %v1068_v42 }
 0x31c   : > { %v1137_v8 = vadd.f32 %v1093_v9, %v1073_v7 }
 0x31e   : > { %1154 = vst.msk [vmem:[#allocation3 + $0x8] sm:$0xff] %vm374_vm0, %v1137_v8 }
 0x31f   : > { %v1096_v55 = vpop.xlane.xlu0 %1095 }
 0x320   : > { %v1138_v25 = vadd.f32 %v1096_v55, %v1074_v63  ;;  %v1069_v63 = vld [vmem:[#allocation3 + $0x68] sm:$0xff] }
 0x321   : > { %v1509_v14 = vld [vmem:[#allocation3] sm:$0xff]  ;;  %v1085_v39 = vmul.f32 %v3178_v30, %v1069_v63 }
 0x322   : > { %1155 = vst.msk [vmem:[#allocation3 + $0x10] sm:$0xff] %vm374_vm0, %v1138_v25  ;;  %2280 = vrcp.f32 %v1509_v14 }
 0x323   : > { %v1099_v41 = vpop.xlane.xlu1 %1098 }
 0x324   : > { %v1139_v60 = vadd.f32 %v1099_v41, %v1075_v17  ;;  %v1070_v17 = vld [vmem:[#allocation3 + $0x70] sm:$0xff] }
 0x325   : > { %v1510_v2 = vld [vmem:[#allocation3 + $0x8] sm:$0xff]  ;;  %v1086_v28 = vmul.f32 %v3182_v52, %v1070_v17 }
 0x326   : > { %1156 = vst.msk [vmem:[#allocation3 + $0x18] sm:$0xff] %vm374_vm0, %v1139_v60  ;;  %2282 = vrcp.f32 %v1510_v2 }
 0x327   : > { %v1102_v47 = vpop.xlane.xlu0 %1101 }
 0x328   : > { %v1140_v50 = vadd.f32 %v1102_v47, %v1076_v16  ;;  %v1071_v16 = vld [vmem:[#allocation3 + $0x78] sm:$0xff] }
 0x329   : > { %v1511_v51 = vld [vmem:[#allocation3 + $0x10] sm:$0xff]  ;;  %v1087_v30 = vmul.f32 %v3184_v11, %v1071_v16 }
 0x32a   : > { %1157 = vst.msk [vmem:[#allocation3 + $0x20] sm:$0xff] %vm374_vm0, %v1140_v50  ;;  %2284 = vrcp.f32 %v1511_v51 }
 0x32b   : > { %v1105_v61 = vpop.xlane.xlu1 %1104 }
 0x32c   : > { %v2281_v49 = vpop.eup %2280  ;;  %v1141_v6 = vadd.f32 %v1105_v61, %v1077_v59 }
 0x32d   : > { %1559 = vperm.xlu1 %2183, %v2281_v49   ;;  %v1512_v20 = vld [vmem:[#allocation3 + $0x18] sm:$0xff] }
 0x32e   : > { %1158 = vst.msk [vmem:[#allocation3 + $0x28] sm:$0xff] %vm374_vm0, %v1141_v6  ;;  %2286 = vrcp.f32 %v1512_v20 }
 0x32f   : > { %v1108_v15 = vpop.xlane.xlu0 %1107 }
 0x330   : > { %v2283_v13 = vpop.eup %2282  ;;  %v1142_v22 = vadd.f32 %v1108_v15, %v1078_v4 }
 0x331   : > { %1564 = vperm.xlu0 %2182, %v2283_v13   ;;  %v1513_v38 = vld [vmem:[#allocation3 + $0x20] sm:$0xff] }
 0x332   : > { %1159 = vst.msk [vmem:[#allocation3 + $0x30] sm:$0xff] %vm374_vm0, %v1142_v22  ;;  %2288 = vrcp.f32 %v1513_v38 }
 0x333   : > { %v1111_v3 = vpop.xlane.xlu1 %1110 }
 0x334   : > { %v2285_v35 = vpop.eup %2284  ;;  %v1143_v57 = vadd.f32 %v1111_v3, %v1079_v1 }
 0x335   : > { %1569 = vperm.xlu1 %2183, %v2285_v35   ;;  %v1514_v54 = vld [vmem:[#allocation3 + $0x28] sm:$0xff] }
 0x336   : > { %1160 = vst.msk [vmem:[#allocation3 + $0x38] sm:$0xff] %vm374_vm0, %v1143_v57  ;;  %2290 = vrcp.f32 %v1514_v54 }
 0x337   : > { %v1114_v24 = vpop.xlane.xlu0 %1113 }
 0x338   : > { %v2287_v10 = vpop.eup %2286  ;;  %v1144_v12 = vadd.f32 %v1114_v24, %v1080_v56 }
 0x339   : > { %1574 = vperm.xlu0 %2182, %v2287_v10   ;;  %v1515_v26 = vld [vmem:[#allocation3 + $0x30] sm:$0xff] }
 0x33a   : > { %1161 = vst.msk [vmem:[#allocation3 + $0x40] sm:$0xff] %vm374_vm0, %v1144_v12  ;;  %2292 = vrcp.f32 %v1515_v26 }
 0x33b   : > { %v1117_v44 = vpop.xlane.xlu1 %1116 }
 0x33c   : > { %v2289_v31 = vpop.eup %2288  ;;  %v1145_v33 = vadd.f32 %v1117_v44, %v1081_v27 }
 0x33d   : > { %1579 = vperm.xlu1 %2183, %v2289_v31   ;;  %v1516_v19 = vld [vmem:[#allocation3 + $0x38] sm:$0xff] }
 0x33e   : > { %1162 = vst.msk [vmem:[#allocation3 + $0x48] sm:$0xff] %vm374_vm0, %v1145_v33  ;;  %2294 = vrcp.f32 %v1516_v19 }
 0x33f   : > { %v1120_v62 = vpop.xlane.xlu0 %1119 }
 0x340   : > { %v2291_v32 = vpop.eup %2290  ;;  %v1146_v40 = vadd.f32 %v1120_v62, %v1082_v21 }
 0x341   : > { %1584 = vperm.xlu0 %2182, %v2291_v32   ;;  %v1517_v45 = vld [vmem:[#allocation3 + $0x40] sm:$0xff] }
 0x342   : > { %1163 = vst.msk [vmem:[#allocation3 + $0x50] sm:$0xff] %vm374_vm0, %v1146_v40  ;;  %2296 = vrcp.f32 %v1517_v45 }
 0x343   : > { %v1123_v48 = vpop.xlane.xlu1 %1122 }
 0x344   : > { %v2293_v7 = vpop.eup %2292  ;;  %v1147_v9 = vadd.f32 %v1123_v48, %v1083_v36 }
 0x345   : > { %1589 = vperm.xlu1 %2183, %v2293_v7   ;;  %v1518_v37 = vld [vmem:[#allocation3 + $0x48] sm:$0xff] }
 0x346   : > { %1164 = vst.msk [vmem:[#allocation3 + $0x58] sm:$0xff] %vm374_vm0, %v1147_v9  ;;  %2298 = vrcp.f32 %v1518_v37 }
 0x347   : > { %v1126_v8 = vpop.xlane.xlu0 %1125 }
 0x348   : > { %v2295_v55 = vpop.eup %2294  ;;  %v1148_v58 = vadd.f32 %v1126_v8, %v1084_v0 }
 0x349   : > { %1594 = vperm.xlu0 %2182, %v2295_v55   ;;  %v1519_v25 = vld [vmem:[#allocation3 + $0x50] sm:$0xff] }
 0x34a   : > { %1165 = vst.msk [vmem:[#allocation3 + $0x60] sm:$0xff] %vm374_vm0, %v1148_v58  ;;  %2300 = vrcp.f32 %v1519_v25 }
 0x34b   : > { %v1129_v14 = vpop.xlane.xlu1 %1128 }
 0x34c   : > { %v2297_v41 = vpop.eup %2296  ;;  %v1149_v46 = vadd.f32 %v1129_v14, %v1085_v39 }
 0x34d   : > { %1599 = vperm.xlu1 %2183, %v2297_v41   ;;  %v1520_v60 = vld [vmem:[#allocation3 + $0x58] sm:$0xff] }
 0x34e   : > { %1166 = vst.msk [vmem:[#allocation3 + $0x68] sm:$0xff] %vm374_vm0, %v1149_v46  ;;  %2302 = vrcp.f32 %v1520_v60 }
 0x34f   : > { %v1132_v2 = vpop.xlane.xlu0 %1131 }
 0x350   : > { %v2299_v47 = vpop.eup %2298  ;;  %v1150_v29 = vadd.f32 %v1132_v2, %v1086_v28 }
 0x351   : > { %1604 = vperm.xlu0 %2182, %v2299_v47   ;;  %v1521_v50 = vld [vmem:[#allocation3 + $0x60] sm:$0xff] }
 0x352   : > { %1167 = vst.msk [vmem:[#allocation3 + $0x70] sm:$0xff] %vm374_vm0, %v1150_v29  ;;  %2304 = vrcp.f32 %v1521_v50 }
 0x353   : > { %v1135_v51 = vpop.xlane.xlu1 %1134 }
 0x354   : > { %v2301_v59 = vpop.eup %2300  ;;  %v1151_v61 = vadd.f32 %v1135_v51, %v1087_v30 }
 0x355   : > { %1609 = vperm.xlu1 %2183, %v2301_v59   ;;  %v1522_v5 = vld [vmem:[#allocation3 + $0x68] sm:$0xff] }
 0x356   : > { %1168 = vst.msk [vmem:[#allocation3 + $0x78] sm:$0xff] %vm374_vm0, %v1151_v61  ;;  %2306 = vrcp.f32 %v1522_v5 }
 0x357   : > { %v1193_v40 = vpop.permute.xlu1 %1192  ;;  %v1188_v42 = vpop.permute.xlu0 %1187 }
 0x358   : > { %v2303_v52 = vpop.eup %2302 }
 0x359   : > { %1614 = vperm.xlu0 %2182, %v2303_v52   ;;  %v1523_v49 = vld [vmem:[#allocation3 + $0x70] sm:$0xff] }
 0x35a   : > { %2308 = vrcp.f32 %v1523_v49 }
 0x35b   : > { %v1198_v9 = vpop.permute.xlu1 %1197  ;;  %v1203_v63 = vpop.permute.xlu0 %1202 }
 0x35c   : > { %v2305_v6 = vpop.eup %2304  ;;  %v1961_v20 = vpop.f32.mrb[0].mxu1 }
 0x35d   : > { %v1962_v4 = vpop.f32.mrb[1].mxu1  ;;  %1619 = vperm.xlu1 %2183, %v2305_v6   ;;  %v1524_v15 = vld [vmem:[#allocation3 + $0x78] sm:$0xff] }
 0x35e   : > { %v3215_v18 = vadd.f32 %v1962_v4, %v1961_v20  ;;  %2310 = vrcp.f32 %v1524_v15 }
 0x35f   : > { %v1208_v25 = vpop.permute.xlu1 %1207  ;;  %v1213_v41 = vpop.permute.xlu0 %1212 }
 0x360   : > { %v2307_v11 = vpop.eup %2306  ;;  %v1964_v13 = vpop.f32.mrb[2].mxu1 }
 0x361   : > { %v1965_v22 = vpop.f32.mrb[3].mxu1  ;;  %1624 = vperm.xlu0 %2182, %v2307_v11   ;;  %v1265_v11 = vmul.f32 0.0, %v1188_v42 }
 0x362   : > { %v3217_v38 = vadd.f32 %v1965_v22, %v1964_v13 }
 0x363   : > { %v1218_v60 = vpop.permute.xlu1 %1217  ;;  %v1223_v47 = vpop.permute.xlu0 %1222  ;;  %v1458_v13 = vadd.f32 %v3215_v18, %v1265_v11 }
 0x364   : > { %v2309_v1 = vpop.eup %2308  ;;  %v1967_v3 = vpop.f32.mrb[4].mxu1 }
 0x365   : > { %v1968_v43 = vpop.f32.mrb[5].mxu1  ;;  %1629 = vperm.xlu1 %2183, %v2309_v1  }
 0x366   : > { %v3219_v35 = vadd.f32 %v1968_v43, %v1967_v3  ;;  %v1266_v3 = vmul.f32 0.0, %v1193_v40 }
 0x367   : > { %v1228_v30 = vpop.permute.xlu1 %1227  ;;  %v1233_v5 = vpop.permute.xlu0 %1232 }
 0x368   : > { %v2311_v57 = vpop.eup %2310  ;;  %v1970_v54 = vpop.f32.mrb[6].mxu1 }
 0x369   : > { %v1971_v56 = vpop.f32.mrb[7].mxu1  ;;  %1634 = vperm.xlu0 %2182, %v2311_v57   ;;  %v1459_v57 = vadd.f32 %v3217_v38, %v1266_v3 }
 0x36a   : > { %v3221_v24 = vadd.f32 %v1971_v56, %v1970_v54  ;;  %v1267_v56 = vmul.f32 0.0, %v1198_v9 }
 0x36b   : > { %v1238_v49 = vpop.permute.xlu1 %1237  ;;  %v1243_v6 = vpop.permute.xlu0 %1242 }
 0x36c   : > { %v1973_v23 = vpop.f32.mrb[8].mxu1  ;;  %v1460_v18 = vadd.f32 %v3219_v35, %v1267_v56 }
 0x36d   : > { %v1974_v10 = vpop.f32.mrb[9].mxu1 }
 0x36e   : > { %v3223_v12 = vadd.f32 %v1974_v10, %v1973_v23 }
 0x36f   : > { %v3247_v20 = vpop.permute.xlu1 %1247  ;;  %v3249_v4 = vpop.permute.xlu0 %1252 }
 0x370   : > { %v1976_v26 = vpop.f32.mrb[10].mxu1 }
 0x371   : > { %v1977_v27 = vpop.f32.mrb[11].mxu1 }
 0x372   : > { %v3225_v44 = vadd.f32 %v1977_v27, %v1976_v26  ;;  %v1268_v26 = vmul.f32 0.0, %v1203_v63 }
 0x373   : > { %v3252_v15 = vpop.permute.xlu1 %1257  ;;  %v3257_v22 = vpop.permute.xlu0 %1262 }
 0x374   : > { %v1979_v53 = vpop.f32.mrb[12].mxu1 }
 0x375   : > { %v1980_v31 = vpop.f32.mrb[13].mxu1 }
 0x376   : > { %v3227_v33 = vadd.f32 %v1980_v31, %v1979_v53  ;;  %v1461_v53 = vadd.f32 %v3221_v24, %v1268_v26 }
 0x378   : > { %v1982_v19 = vpop.f32.mrb[14].mxu1 }
 0x379   : > { %v1983_v21 = vpop.f32.mrb[15].mxu1 }
 0x37a   : > { %v3229_v62 = vadd.f32 %v1983_v21, %v1982_v19  ;;  %v1269_v19 = vmul.f32 0.0, %v1208_v25 }
 0x37c   : > { %v1985_v34 = vpop.f32.mrb[16].mxu1  ;;  %v1462_v38 = vadd.f32 %v3223_v12, %v1269_v19 }
 0x37d   : > { %v1986_v32 = vpop.f32.mrb[17].mxu1 }
 0x37e   : > { %v3231_v45 = vadd.f32 %v1986_v32, %v1985_v34  ;;  %v1270_v32 = vmul.f32 0.0, %v1213_v41 }
 0x380   : > { %v1988_v36 = vpop.f32.mrb[18].mxu1  ;;  %v1463_v35 = vadd.f32 %v3225_v44, %v1270_v32 }
 0x381   : > { %v1989_v48 = vpop.f32.mrb[19].mxu1 }
 0x382   : > { %v3233_v7 = vadd.f32 %v1989_v48, %v1988_v36  ;;  %v1271_v48 = vmul.f32 0.0, %v1218_v60  ;;  %v1275_v60 = vmul.f32 0.0, %v1238_v49 }
 0x384   : > { %v1991_v37 = vpop.f32.mrb[20].mxu1  ;;  %v1464_v24 = vadd.f32 %v3227_v33, %v1271_v48 }
 0x385   : > { %v1992_v0 = vpop.f32.mrb[21].mxu1 }
 0x386   : > { %v3235_v8 = vadd.f32 %v1992_v0, %v1991_v37  ;;  %v1272_v37 = vmul.f32 0.0, %v1223_v47  ;;  %v1276_v47 = vmul.f32 0.0, %v1243_v6 }
 0x388   : > { %v1994_v55 = vpop.f32.mrb[22].mxu1  ;;  %v1465_v12 = vadd.f32 %v3229_v62, %v1272_v37  ;;  %v1468_v62 = vadd.f32 %v3235_v8, %v1275_v60 }
 0x389   : > { %v1995_v58 = vpop.f32.mrb[23].mxu1 }
 0x38a   : > { %v3237_v39 = vadd.f32 %v1995_v58, %v1994_v55  ;;  %v1273_v55 = vmul.f32 0.0, %v1228_v30  ;;  %v1277_v30 = vmul.f32 0.0, %v3247_v20 }
 0x38c   : > { %v1997_v14 = vpop.f32.mrb[24].mxu1  ;;  %v1466_v44 = vadd.f32 %v3231_v45, %v1273_v55  ;;  %v1469_v45 = vadd.f32 %v3237_v39, %v1276_v47  ;;  %v1279_v39 = vmul.f32 0.0, %v3252_v15 }
 0x38d   : > { %v1998_v17 = vpop.f32.mrb[25].mxu1 }
 0x38e   : > { %v3239_v46 = vadd.f32 %v1998_v17, %v1997_v14  ;;  %v1274_v14 = vmul.f32 0.0, %v1233_v5  ;;  %v1278_v5 = vmul.f32 0.0, %v3249_v4  ;;  %v1280_v4 = vmul.f32 0.0, %v3257_v22 }
 0x390   : > { %v2000_v28 = vpop.f32.mrb[26].mxu1  ;;  %v1467_v33 = vadd.f32 %v3233_v7, %v1274_v14 }
 0x391   : > { %v2001_v2 = vpop.f32.mrb[27].mxu1 }
 0x392   : > { %v3241_v16 = vadd.f32 %v2001_v2, %v2000_v28 }
 0x394   : > { %v2003_v29 = vpop.f32.mrb[28].mxu1  ;;  %v1471_v49 = vadd.f32 %v3241_v16, %v1278_v5 }
 0x395   : > { %v2004_v50 = vpop.f32.mrb[29].mxu1 }
 0x396   : > { %v3243_v51 = vadd.f32 %v2004_v50, %v2003_v29 }
 0x398   : > { %v2006_v59 = vpop.f32.mrb[30].mxu1 }
 0x399   : > { %v2007_v61 = vpop.f32.mrb[31].mxu1 }
 0x39a   : > { %v3245_v52 = vadd.f32 %v2007_v61, %v2006_v59  ;;  %v1470_v59 = vadd.f32 %v3239_v46, %v1277_v30  ;;  %v1472_v46 = vadd.f32 %v3243_v51, %v1279_v39 }
 0x39c   : > { %v1473_v16 = vadd.f32 %v3245_v52, %v1280_v4 }
 0x3ac   : > { %v1560_v1 = vpop.permute.xlu1 %1559 }
 0x3ad   : > { %v1637_v43 = vmul.f32 %v1560_v1, %v1458_v13 }
 0x3af   : > { %1653 = vst [vmem:[%s3259_s29] sm:$0xff] %v1637_v43 }
 0x3b0   : > { %v1565_v54 = vpop.permute.xlu0 %1564 }
 0x3b1   : > { %v1638_v23 = vmul.f32 %v1565_v54, %v1459_v57 }
 0x3b3   : > { %1654 = vst [vmem:[%s3259_s29 + $0x8] sm:$0xff] %v1638_v23 }
 0x3b4   : > { %v1570_v10 = vpop.permute.xlu1 %1569 }
 0x3b5   : > { %v1639_v27 = vmul.f32 %v1570_v10, %v1460_v18 }
 0x3b7   : > { %1655 = vst [vmem:[%s3259_s29 + $0x10] sm:$0xff] %v1639_v27 }
 0x3b8   : > { %v1575_v31 = vpop.permute.xlu0 %1574 }
 0x3b9   : > { %v1640_v21 = vmul.f32 %v1575_v31, %v1461_v53 }
 0x3bb   : > { %1656 = vst [vmem:[%s3259_s29 + $0x18] sm:$0xff] %v1640_v21 }
 0x3bc   : > { %v1580_v34 = vpop.permute.xlu1 %1579 }
 0x3bd   : > { %v1641_v40 = vmul.f32 %v1580_v34, %v1462_v38 }
 0x3bf   : > { %1657 = vst [vmem:[%s3259_s29 + $0x20] sm:$0xff] %v1641_v40 }
 0x3c0   : > { %v1585_v36 = vpop.permute.xlu0 %1584 }
 0x3c1   : > { %v1642_v42 = vmul.f32 %v1585_v36, %v1463_v35 }
 0x3c3   : > { %1658 = vst [vmem:[%s3259_s29 + $0x28] sm:$0xff] %v1642_v42 }
 0x3c4   : > { %v1590_v9 = vpop.permute.xlu1 %1589 }
 0x3c5   : > { %v1643_v0 = vmul.f32 %v1590_v9, %v1464_v24 }
 0x3c7   : > { %1659 = vst [vmem:[%s3259_s29 + $0x30] sm:$0xff] %v1643_v0 }
 0x3c8   : > { %v1595_v63 = vpop.permute.xlu0 %1594 }
 0x3c9   : > { %v1644_v58 = vmul.f32 %v1595_v63, %v1465_v12 }
 0x3cb   : > { %1660 = vst [vmem:[%s3259_s29 + $0x38] sm:$0xff] %v1644_v58 }
 0x3cc   : > { %v1600_v25 = vpop.permute.xlu1 %1599 }
 0x3cd   : > { %v1645_v17 = vmul.f32 %v1600_v25, %v1466_v44 }
 0x3cf   : > { %1661 = vst [vmem:[%s3259_s29 + $0x40] sm:$0xff] %v1645_v17 }
 0x3d0   : > { %v1605_v41 = vpop.permute.xlu0 %1604 }
 0x3d1   : > { %v1646_v28 = vmul.f32 %v1605_v41, %v1467_v33 }
 0x3d3   : > { %1662 = vst [vmem:[%s3259_s29 + $0x48] sm:$0xff] %v1646_v28 }
 0x3d4   : > { %v1610_v2 = vpop.permute.xlu1 %1609 }
 0x3d5   : > { %v1647_v29 = vmul.f32 %v1610_v2, %v1468_v62 }
 0x3d7   : > { %1663 = vst [vmem:[%s3259_s29 + $0x50] sm:$0xff] %v1647_v29 }
 0x3d8   : > { %v1615_v50 = vpop.permute.xlu0 %1614 }
 0x3d9   : > { %v1648_v7 = vmul.f32 %v1615_v50, %v1469_v45 }
 0x3db   : > { %1664 = vst [vmem:[%s3259_s29 + $0x58] sm:$0xff] %v1648_v7 }
 0x3dc   : > { %v1620_v61 = vpop.permute.xlu1 %1619 }
 0x3dd   : > { %v1649_v8 = vmul.f32 %v1620_v61, %v1470_v59 }
 0x3df   : > { %1665 = vst [vmem:[%s3259_s29 + $0x60] sm:$0xff] %v1649_v8 }
 0x3e0   : > { %v1625_v6 = vpop.permute.xlu0 %1624 }
 0x3e1   : > { %v1650_v20 = vmul.f32 %v1625_v6, %v1471_v49 }
 0x3e3   : > { %1666 = vst [vmem:[%s3259_s29 + $0x68] sm:$0xff] %v1650_v20 }
 0x3e4   : > { %v1630_v11 = vpop.permute.xlu1 %1629 }
 0x3e5   : > { %v1651_v13 = vmul.f32 %v1630_v11, %v1472_v46 }
 0x3e7   : > { %1667 = vst [vmem:[%s3259_s29 + $0x70] sm:$0xff] %v1651_v13 }
 0x3e8   : > { %v1635_v15 = vpop.permute.xlu0 %1634 }
 0x3e9   : > { %v1652_v51 = vmul.f32 %v1635_v15, %v1473_v16 }
 0x3eb   : > { %1668 = vst [vmem:[%s3259_s29 + $0x78] sm:$0xff] %v1652_v51 }
 0x3ec   : > { %2355 = shalt.err (!%p2352_p13)
}
 0x3ed   : > { %s2356_s21 = scalar_lea.hbm %s3299_s30, 2048  ;;  %s2360_s7 = scalar_lea.hbm %s3373_s4, 32768 }
 0x3ee   : > { %p2357_p5 = scmp.ne.s32.totalorder %s3299_s30, %s2356_s21  ;;  %p2361_p12 = scmp.lt.u32.totalorder %s3299_s30, %s3373_s4 }
 0x3ef   : > { %p2362_p2 = scmp.lt.u32.totalorder %s2360_s7, %s2356_s21  ;;  %p2364_p4 = scmp.lt.u32.totalorder %s2356_s21, %s3299_s30 }
 0x3f0   : > { %p2358_p8 = pnand %p2357_p5, %p3442_p0 }
 0x3f1   : > { %p2363_p7 = por %p2362_p2, %p2361_p12 }
 0x3f2   : > { %p2359_p10 = pneg %p2358_p8 }
 0x3f3   : > { %p2365_p1 = por %p2364_p4, %p2363_p7 }
 0x3f5   : > { %p2366_p6 = pnand %p2365_p1, %p2359_p10 }
 0x3f7   : > { %2369 = shalt.err (!%p2366_p6)
}
 0x3f8   : > { %s2473_s5 = smov 128   ;;  %s2474_s18 = smov 8  }
 0x3f9   : > { %2075 = dma.vmem_to_hbm [thread:$0]  (%p3442_p0), %s3303_s22, 2048, %s3299_s30, %s3308_s28, %s2473_s5, %s2473_s5, %s2474_s18  }
 0x3fa PF: > { %p2086_p9 = scmp.ge.s32.totalorder %s2464_s25, 2  ;;  %s1700_s26 = sand.u32 1, %s2424_s15  }
 0x3fb   : > { %p3443_p3 = scmp.ne.s32.totalorder %s3395_s14, 0  ;;  %s1701_s27 = scalar_lea.sflag [#allocation7], %s1700_s26 }
 0x3fd   : > { %p2082_p11 = pnand %p2086_p9, %p3443_p3 }
 0x3ff   : > { %2419 = dma.done.wait (!%p2082_p11), %s1701_s27, 2048  }
 0x400   : > { %2421 = vsyncadd (!%p2082_p11), %s1701_s27, 4294965248  ;;  %s20_s25 = sadd.s32 1, %s2464_s25   ;;  %s3444_s11 = sld [smem:[#allocation11_spill]] }
 0x401   : > { %p17_p13 = scmp.ge.s32.totalorder %s20_s25, 18   ;;  %s3445_s30 = sld [smem:[#allocation12_spill]] }
 0x402   : > { %s3446_s15 = smov %s2428_s16  ;;  %s3447_s16 = smov %s2432_s17 }
 0x403   : > { %s3448_s17 = smov %s2590_s13  ;;  %s3449_s18 = smov %s2440_s19 }
 0x404   : > { %s3450_s19 = smov %s2444_s20  ;;  %s3451_s20 = smov %s2587_s12 }
 0x405   : > { %s3452_s21 = smov %s2456_s23  ;;  %s3453_s22 = smov %s2460_s24 }
 0x406   : > { %s3454_s23 = smov %s3444_s11  ;;  %19 = sbr.rel (!%p17_p13) target bundleno = 9 (0x9), region = 98 }
 0x407   : > { %s3455_s24 = smov %s3445_s30 }
 0x40d   :  { %1706 = vsyncpa [#allocation6], 1 }
 0x40e   :  { %1708 = vsyncpa [#allocation6 + $0x1], 1 }
 0x40f   :  { %1709 = vsyncpa [#allocation7], 1 }
 0x410   :  { %1711 = vsyncpa [#allocation7 + $0x1], 1 }

</bundles_post_ra>
